<compile_context>
chip_gen: v6e
topology: v6e:2x2x1
jax: 0.10.0
libtpu: 0.0.40
codegen_flags: <defaults>
</compile_context>

<pallas_src>
import functools

import jax
import jax.numpy as jnp
from jax import lax
from jax.experimental import pallas as pl
from jax.experimental.pallas import tpu as pltpu

_NEG = -1e30            # finite "-inf" used to mask padded rows / columns
_FAST_SCALE_MAX = 30.0  # |logits| <= logit_scale, so spread <= 2*scale <= 60: safe
_EXP_CLAMP = 64.0       # clamp only ever bites on fully-masked (padding) rows/cols


def _contrastive_kernel(scale_ref, a_ref, b_ref,                 # inputs
                        loss_ref, acc_ab_ref, acc_ba_ref,        # outputs (SMEM)
                        row_m, row_l, row_d,                     # per-row-block scratch
                        col_m, col_l, col_d,                     # per-column scratch
                        ce_sum, diag_sum, corr_ab,               # scalar accumulators
                        *, n):
    i = pl.program_id(0)          # row-tile index (outer)
    j = pl.program_id(1)          # col-tile index (inner)
    ni = pl.num_programs(0)
    nj = pl.num_programs(1)
    tm = a_ref.shape[0]

    # ------------------------------------------------------------------
    # Initialization: scalar accumulators once, row stats per row sweep,
    # column stats once per column block (first time it is visited, i == 0).
    # ------------------------------------------------------------------
    @pl.when(jnp.logical_and(i == 0, j == 0))
    def _init_scalars():
        ce_sum[...] = jnp.zeros_like(ce_sum)
        diag_sum[...] = jnp.zeros_like(diag_sum)
        corr_ab[...] = jnp.zeros_like(corr_ab)

    @pl.when(j == 0)
    def _init_row_stats():
        row_m[...] = jnp.full_like(row_m, -jnp.inf)
        row_l[...] = jnp.zeros_like(row_l)

    @pl.when(i == 0)
    def _init_col_stats():
        col_m[j] = jnp.full(col_m.shape[1:], -jnp.inf, jnp.float32)
        col_l[j] = jnp.zeros(col_l.shape[1:], jnp.float32)

    # ------------------------------------------------------------------
    # Single MXU matmul for this tile (contract last dims; operands are the
    # wrapper-normalized bf16 features, logit_scale already folded into A).
    # ------------------------------------------------------------------
    s = lax.dot_general(a_ref[...], b_ref[...],
                        dimension_numbers=(((1,), (1,)), ((), ())),
                        preferred_element_type=jnp.float32)          # (tm, tm)

    row_ids = i * tm + lax.broadcasted_iota(jnp.int32, (tm, 1), 0)   # (tm, 1)
    col_ids = j * tm + lax.broadcasted_iota(jnp.int32, (1, tm), 1)   # (1, tm)
    row_ok = row_ids < n
    col_ok = col_ids < n
    s = jnp.where(row_ok, jnp.where(col_ok, s, _NEG), _NEG)

    # ---- online max merge (shared between the two exp paths) ----------
    t_rmax = jnp.max(s, axis=1, keepdims=True)       # (tm, 1)
    t_cmax = jnp.max(s, axis=0, keepdims=True)       # (1, tm)
    m_r_old = row_m[...]
    m_c_old = col_m[j]
    m_r_new = jnp.maximum(m_r_old, t_rmax)
    m_c_new = jnp.maximum(m_c_old, t_cmax)
    alpha_r = jnp.exp(m_r_old - m_r_new)
    alpha_c = jnp.exp(m_c_old - m_c_new)
    row_m[...] = m_r_new
    col_m[j] = m_c_new

    scale = scale_ref[0, 0]

    # ---- fast path: ONE exp tile shifted by the analytic bound `scale`,
    # reused for both the row and the column sum-exp.  Safe because the guard
    # bounds the in-tile spread of valid logits to 2*scale <= 60.
    @pl.when(scale <= _FAST_SCALE_MAX)
    def _single_exp_path():
        p = jnp.exp(s - scale)                                    # (tm, tm)
        fr = jnp.exp(jnp.minimum(scale - m_r_new, _EXP_CLAMP))    # (tm, 1)
        fc = jnp.exp(jnp.minimum(scale - m_c_new, _EXP_CLAMP))    # (1, tm)
        row_l[...] = row_l[...] * alpha_r + jnp.sum(p, axis=1, keepdims=True) * fr
        col_l[j] = col_l[j] * alpha_c + jnp.sum(p, axis=0, keepdims=True) * fc

    # ---- slow path (large logit_scale): standard two-exp online softmax.
    @pl.when(scale > _FAST_SCALE_MAX)
    def _double_exp_path():
        row_l[...] = (row_l[...] * alpha_r
                      + jnp.sum(jnp.exp(s - m_r_new), axis=1, keepdims=True))
        col_l[j] = (col_l[j] * alpha_c
                    + jnp.sum(jnp.exp(s - m_c_new), axis=0, keepdims=True))

    # ---- label logits (diagonal) come straight from the j == i tile --------
    @pl.when(j == i)
    def _grab_diag():
        rl = lax.broadcasted_iota(jnp.int32, (tm, 1), 0)
        cl = lax.broadcasted_iota(jnp.int32, (1, tm), 1)
        d = jnp.where(rl == cl, s, 0.0)
        row_d[...] = jnp.sum(d, axis=1, keepdims=True)    # (tm, 1)
        col_d[j] = jnp.sum(d, axis=0, keepdims=True)      # (1, tm)

    # ---- A->B direction finalized at the end of each row sweep -------------
    @pl.when(j == nj - 1)
    def _row_block_done():
        lse = row_m[...] + jnp.log(row_l[...])
        ce_sum[...] += jnp.sum(jnp.where(row_ok, lse - row_d[...], 0.0))
        diag_sum[...] += jnp.sum(jnp.where(row_ok, row_d[...], 0.0))
        hit = jnp.logical_and(row_ok, row_d[...] >= row_m[...])
        corr_ab[...] += jnp.sum(jnp.where(hit, 1.0, 0.0))

    # ---- B->A direction + outputs finalized on the very last step ----------
    @pl.when(jnp.logical_and(i == ni - 1, j == nj - 1))
    def _finalize():
        col_valid = col_m[...] > (_NEG * 0.5)        # padded columns never got data
        col_lse = col_m[...] + jnp.log(col_l[...])
        ce_ba_sum = jnp.sum(jnp.where(col_valid, col_lse, 0.0))
        hit_ba = jnp.logical_and(col_valid, col_d[...] >= col_m[...])
        corr_ba = jnp.sum(jnp.where(hit_ba, 1.0, 0.0))
        inv_n = jnp.float32(1.0 / n)
        ce_ab = ce_sum[0, 0] * inv_n
        ce_ba = (ce_ba_sum - diag_sum[0, 0]) * inv_n
        loss_ref[0, 0] = (ce_ab + ce_ba) * jnp.float32(0.5)
        acc_ab_ref[0, 0] = corr_ab[0, 0] * inv_n
        acc_ba_ref[0, 0] = corr_ba * inv_n


def contrastive_loss(feature_A, feature_B, logit_scale, *,
                     block_size=256, compute_dtype=jnp.bfloat16):
    """feature_A, feature_B: (B, D); logit_scale: scalar.  Returns dict of scalars.

    block_size: square logits-tile edge.  256 is a good default on v6e/v7x;
    use 128 on v5e (matches the 128-wide MXU and its smaller scoped VMEM).
    """
    B, D = feature_A.shape
    assert feature_B.shape == (B, D)

    tm = min(block_size, B)
    tm = max(16, (tm // 16) * 16)            # 16-multiple: bf16 sublane packing
    nt = pl.cdiv(B, tm)
    b_pad = nt * tm
    d_pad = ((D + 127) // 128) * 128         # MXU K-dim alignment

    fa = feature_A.astype(jnp.float32)
    fb = feature_B.astype(jnp.float32)
    scale = jnp.asarray(logit_scale, jnp.float32)
    # F.normalize(x, p=2, dim=-1): x * rsqrt(max(sum(x^2), eps^2)), eps = 1e-12.
    inv_na = lax.rsqrt(jnp.maximum(jnp.sum(fa * fa, -1, keepdims=True), 1e-24))
    inv_nb = lax.rsqrt(jnp.maximum(jnp.sum(fb * fb, -1, keepdims=True), 1e-24))
    a_s = ((fa * inv_na) * scale).astype(compute_dtype)   # logit_scale folded into A
    b_n = (fb * inv_nb).astype(compute_dtype)
    # Zero-pad so every block read is in bounds; padded rows/cols are masked
    # by index inside the kernel.
    a_s = jnp.pad(a_s, ((0, b_pad - B), (0, d_pad - D)))
    b_n = jnp.pad(b_n, ((0, b_pad - B), (0, d_pad - D)))

    scalar_out = jax.ShapeDtypeStruct((1, 1), jnp.float32)
    smem11 = pl.BlockSpec((1, 1), lambda i, j: (0, 0),
                          memory_space=pltpu.MemorySpace.SMEM)

    kernel = functools.partial(_contrastive_kernel, n=B)
    loss, acc_ab, acc_ba = pl.pallas_call(
        kernel,
        out_shape=(scalar_out, scalar_out, scalar_out),
        grid_spec=pltpu.PrefetchScalarGridSpec(
            num_scalar_prefetch=0,
            grid=(nt, nt),                                  # rows outer, cols inner
            in_specs=[
                smem11,                                           # logit_scale
                pl.BlockSpec((tm, d_pad), lambda i, j: (i, 0)),   # A row tile
                pl.BlockSpec((tm, d_pad), lambda i, j: (j, 0)),   # B col tile
            ],
            out_specs=(smem11, smem11, smem11),
            scratch_shapes=[
                pltpu.VMEM((tm, 1), jnp.float32),       # row running max
                pltpu.VMEM((tm, 1), jnp.float32),       # row running sum-exp
                pltpu.VMEM((tm, 1), jnp.float32),       # row diag (label logits)
                pltpu.VMEM((nt, 1, tm), jnp.float32),   # column running max
                pltpu.VMEM((nt, 1, tm), jnp.float32),   # column running sum-exp
                pltpu.VMEM((nt, 1, tm), jnp.float32),   # column diag
                pltpu.VMEM((1, 1), jnp.float32),        # sum_i (lse_i - diag_i)
                pltpu.VMEM((1, 1), jnp.float32),        # sum_i diag_i
                pltpu.VMEM((1, 1), jnp.float32),        # A->B correct count
            ]),
        compiler_params=pltpu.CompilerParams(
            # Both axes carry online accumulators -> serial.
            dimension_semantics=("arbitrary", "arbitrary"),
            vmem_limit_bytes=32 * 1024 * 1024),
    )(jnp.reshape(scale, (1, 1)), a_s, b_n)

    return {
        'loss_A_B': loss[0, 0],
        'A_B_acc': acc_ab[0, 0],
        'B_A_acc': acc_ba[0, 0],
    }


if __name__ == "__main__":
    B, D = 24, 32
    key = jax.random.PRNGKey(0)
    ka, kb = jax.random.split(key)
    feature_A = jax.random.normal(ka, (B, D), dtype=jnp.float32)
    feature_B = jax.random.normal(kb, (B, D), dtype=jnp.float32)

    # Pure-JAX reference mirroring the kernel precision:
    # f32 normalize, bf16 MXU operands with logit_scale folded in, f32 accumulation.
    def reference(fa, fb, scale):
        inv_na = lax.rsqrt(jnp.maximum(jnp.sum(fa * fa, -1, keepdims=True), 1e-24))
        inv_nb = lax.rsqrt(jnp.maximum(jnp.sum(fb * fb, -1, keepdims=True), 1e-24))
        a_c = ((fa * inv_na) * scale).astype(jnp.bfloat16)
        b_c = (fb * inv_nb).astype(jnp.bfloat16)
        l_ab = lax.dot_general(a_c, b_c, (((1,), (1,)), ((), ())),
                               preferred_element_type=jnp.float32)
        l_ba = l_ab.T
        n = fa.shape[0]
        labels = jnp.arange(n)

        def ce(lg):
            return jnp.mean(jax.nn.logsumexp(lg, axis=-1) - lg[labels, labels])

        return {
            'loss_A_B': (ce(l_ab) + ce(l_ba)) * 0.5,
            'A_B_acc': jnp.mean((jnp.argmax(l_ab, -1) == labels).astype(jnp.float32)),
            'B_A_acc': jnp.mean((jnp.argmax(l_ba, -1) == labels).astype(jnp.float32)),
        }

    # block_size=16 with B=24 -> a 2x2 tile grid: exercises column tiling,
    # ragged-row/column masking, the diagonal tiles and the online column stats.
    # scale=1/0.07 takes the single-exp fast path; scale=100 takes the guarded
    # two-exp fallback path.
    for scale_val in (1.0 / 0.07, 100.0):
        out = contrastive_loss(feature_A, feature_B, jnp.float32(scale_val),
                               block_size=16)
        out = jax.block_until_ready(out)
        ref = reference(feature_A, feature_B, jnp.float32(scale_val))
        assert jnp.allclose(out['loss_A_B'], ref['loss_A_B'], rtol=1e-3, atol=1e-3), \
            (scale_val, out['loss_A_B'], ref['loss_A_B'])
        assert jnp.allclose(out['A_B_acc'], ref['A_B_acc']), \
            (scale_val, out['A_B_acc'], ref['A_B_acc'])
        assert jnp.allclose(out['B_A_acc'], ref['B_A_acc']), \
            (scale_val, out['B_A_acc'], ref['B_A_acc'])

    print("KERNEL_OK")
</pallas_src>

<mosaic_0001>
module attributes {stable_mosaic.version = 11 : i64} {
  func.func @_contrastive_kernel(%arg0: i32, %arg1: i32, %arg2: memref<1x1xf32, #tpu.memory_space<smem>>, %arg3: memref<16x128xbf16, #tpu.memory_space<vmem>>, %arg4: memref<16x128xbf16, #tpu.memory_space<vmem>>, %arg5: memref<1x1xf32, #tpu.memory_space<smem>>, %arg6: memref<1x1xf32, #tpu.memory_space<smem>>, %arg7: memref<1x1xf32, #tpu.memory_space<smem>>, %arg8: memref<16x1xf32, #tpu.memory_space<vmem>>, %arg9: memref<16x1xf32, #tpu.memory_space<vmem>>, %arg10: memref<16x1xf32, #tpu.memory_space<vmem>>, %arg11: memref<2x1x16xf32, #tpu.memory_space<vmem>>, %arg12: memref<2x1x16xf32, #tpu.memory_space<vmem>>, %arg13: memref<2x1x16xf32, #tpu.memory_space<vmem>>, %arg14: memref<1x1xf32, #tpu.memory_space<vmem>>, %arg15: memref<1x1xf32, #tpu.memory_space<vmem>>, %arg16: memref<1x1xf32, #tpu.memory_space<vmem>>) attributes {dimension_semantics = [#tpu.dimension_semantics<arbitrary>, #tpu.dimension_semantics<arbitrary>], iteration_bounds = array<i64: 2, 2>, scalar_prefetch = 0 : i64, scratch_operands = 9 : i64, tpu.core_type = #tpu.core_type<tc>, window_params = [{transform_indices = @transform_0, window_bounds = array<i64: 1, 1>}, {transform_indices = @transform_1, window_bounds = array<i64: 16, 128>}, {transform_indices = @transform_2, window_bounds = array<i64: 16, 128>}, {transform_indices = @transform_3, window_bounds = array<i64: 1, 1>}, {transform_indices = @transform_4, window_bounds = array<i64: 1, 1>}, {transform_indices = @transform_5, window_bounds = array<i64: 1, 1>}]} {
    %c0_i32 = arith.constant 0 : i32
    %0 = arith.cmpi eq, %arg0, %c0_i32 : i32
    %c0_i32_0 = arith.constant 0 : i32
    %1 = arith.cmpi eq, %arg1, %c0_i32_0 : i32
    %2 = arith.andi %0, %1 : i1
    %3 = arith.extui %2 : i1 to i32
    %c0_i32_1 = arith.constant 0 : i32
    %4 = arith.cmpi ne, %3, %c0_i32_1 : i32
    scf.if %4 {
      %cst_34 = arith.constant 0.000000e+00 : f32
      %71 = vector.broadcast %cst_34 : f32 to vector<1x1xf32>
      %c0_35 = arith.constant 0 : index
      %c0_36 = arith.constant 0 : index
      %72 = vector.load %arg14[%c0_35, %c0_36] : memref<1x1xf32, #tpu.memory_space<vmem>>, vector<1x1xf32>
      tpu.vector_store %arg14[%c0_35, %c0_36], %71 {strides = array<i32>} : memref<1x1xf32, #tpu.memory_space<vmem>>, vector<1x1xf32>,
      %cst_37 = arith.constant 0.000000e+00 : f32
      %73 = vector.broadcast %cst_37 : f32 to vector<1x1xf32>
      %c0_38 = arith.constant 0 : index
      %c0_39 = arith.constant 0 : index
      %74 = vector.load %arg15[%c0_38, %c0_39] : memref<1x1xf32, #tpu.memory_space<vmem>>, vector<1x1xf32>
      tpu.vector_store %arg15[%c0_38, %c0_39], %73 {strides = array<i32>} : memref<1x1xf32, #tpu.memory_space<vmem>>, vector<1x1xf32>,
      %cst_40 = arith.constant 0.000000e+00 : f32
      %75 = vector.broadcast %cst_40 : f32 to vector<1x1xf32>
      %c0_41 = arith.constant 0 : index
      %c0_42 = arith.constant 0 : index
      %76 = vector.load %arg16[%c0_41, %c0_42] : memref<1x1xf32, #tpu.memory_space<vmem>>, vector<1x1xf32>
      tpu.vector_store %arg16[%c0_41, %c0_42], %75 {strides = array<i32>} : memref<1x1xf32, #tpu.memory_space<vmem>>, vector<1x1xf32>,
    } else {
    }
    %c0_i32_2 = arith.constant 0 : i32
    %5 = arith.cmpi eq, %arg1, %c0_i32_2 : i32
    %6 = arith.extui %5 : i1 to i32
    %c0_i32_3 = arith.constant 0 : i32
    %7 = arith.cmpi ne, %6, %c0_i32_3 : i32
    scf.if %7 {
      %cst_34 = arith.constant 0xFF800000 : f32
      %71 = vector.broadcast %cst_34 : f32 to vector<16x1xf32>
      %c0_35 = arith.constant 0 : index
      %c0_36 = arith.constant 0 : index
      %72 = vector.load %arg8[%c0_35, %c0_36] : memref<16x1xf32, #tpu.memory_space<vmem>>, vector<16x1xf32>
      tpu.vector_store %arg8[%c0_35, %c0_36], %71 {strides = array<i32>} : memref<16x1xf32, #tpu.memory_space<vmem>>, vector<16x1xf32>,
      %cst_37 = arith.constant 0.000000e+00 : f32
      %73 = vector.broadcast %cst_37 : f32 to vector<16x1xf32>
      %c0_38 = arith.constant 0 : index
      %c0_39 = arith.constant 0 : index
      %74 = vector.load %arg9[%c0_38, %c0_39] : memref<16x1xf32, #tpu.memory_space<vmem>>, vector<16x1xf32>
      tpu.vector_store %arg9[%c0_38, %c0_39], %73 {strides = array<i32>} : memref<16x1xf32, #tpu.memory_space<vmem>>, vector<16x1xf32>,
    } else {
    }
    %c0_i32_4 = arith.constant 0 : i32
    %8 = arith.cmpi eq, %arg0, %c0_i32_4 : i32
    %9 = arith.extui %8 : i1 to i32
    %c0_i32_5 = arith.constant 0 : i32
    %10 = arith.cmpi ne, %9, %c0_i32_5 : i32
    scf.if %10 {
      %cst_34 = arith.constant 0xFF800000 : f32
      %71 = vector.broadcast %cst_34 : f32 to vector<1x16xf32>
      %72 = arith.index_cast %arg1 : i32 to index
      %c0_35 = arith.constant 0 : index
      %c0_36 = arith.constant 0 : index
      %73 = vector.load %arg11[%72, %c0_35, %c0_36] : memref<2x1x16xf32, #tpu.memory_space<vmem>>, vector<1x1x16xf32>
      %74 = vector.shape_cast %73 : vector<1x1x16xf32> to vector<1x16xf32>
      %75 = vector.shape_cast %71 : vector<1x16xf32> to vector<1x1x16xf32>
      tpu.vector_store %arg11[%72, %c0_35, %c0_36], %75 {strides = array<i32>} : memref<2x1x16xf32, #tpu.memory_space<vmem>>, vector<1x1x16xf32>,
      %cst_37 = arith.constant 0.000000e+00 : f32
      %76 = vector.broadcast %cst_37 : f32 to vector<1x16xf32>
      %77 = arith.index_cast %arg1 : i32 to index
      %c0_38 = arith.constant 0 : index
      %c0_39 = arith.constant 0 : index
      %78 = vector.load %arg12[%77, %c0_38, %c0_39] : memref<2x1x16xf32, #tpu.memory_space<vmem>>, vector<1x1x16xf32>
      %79 = vector.shape_cast %78 : vector<1x1x16xf32> to vector<1x16xf32>
      %80 = vector.shape_cast %76 : vector<1x16xf32> to vector<1x1x16xf32>
      tpu.vector_store %arg12[%77, %c0_38, %c0_39], %80 {strides = array<i32>} : memref<2x1x16xf32, #tpu.memory_space<vmem>>, vector<1x1x16xf32>,
    } else {
    }
    %c0 = arith.constant 0 : index
    %c0_6 = arith.constant 0 : index
    %11 = vector.load %arg3[%c0, %c0_6] : memref<16x128xbf16, #tpu.memory_space<vmem>>, vector<16x128xbf16>
    %c0_7 = arith.constant 0 : index
    %c0_8 = arith.constant 0 : index
    %12 = vector.load %arg4[%c0_7, %c0_8] : memref<16x128xbf16, #tpu.memory_space<vmem>>, vector<16x128xbf16>
    %cst = arith.constant dense<0.000000e+00> : vector<16x16xf32>
    %13 = tpu.matmul %11, %12, %cst {dimension_numbers = #tpu.dot_dimension_numbers<[1], [1], [0], [0], [0, 0, 1, 0], [], []>} : vector<16x128xbf16>, vector<16x128xbf16>, vector<16x16xf32> -> vector<16x16xf32>
    %c16_i32 = arith.constant 16 : i32
    %14 = arith.muli %arg0, %c16_i32 : i32
    %15 = tpu.iota {dimensions = array<i32: 0>} : vector<16x1xi32>
    %16 = vector.broadcast %14 : i32 to vector<16x1xi32>
    %17 = arith.addi %16, %15 : vector<16x1xi32>
    %c16_i32_9 = arith.constant 16 : i32
    %18 = arith.muli %arg1, %c16_i32_9 : i32
    %19 = tpu.iota {dimensions = array<i32: 1>} : vector<1x16xi32>
    %20 = vector.broadcast %18 : i32 to vector<1x16xi32>
    %21 = arith.addi %20, %19 : vector<1x16xi32>
    %c24_i32 = arith.constant 24 : i32
    %22 = vector.broadcast %c24_i32 : i32 to vector<16x1xi32>
    %23 = arith.cmpi slt, %17, %22 : vector<16x1xi32>
    %c24_i32_10 = arith.constant 24 : i32
    %24 = vector.broadcast %c24_i32_10 : i32 to vector<1x16xi32>
    %25 = arith.cmpi slt, %21, %24 : vector<1x16xi32>
    %cst_11 = arith.constant -1.000000e+30 : f32
    %26 = vector.shape_cast %25 : vector<1x16xi1> to vector<1x16xi1>
    %27 = vector.broadcast %26 : vector<1x16xi1> to vector<16x16xi1>
    %28 = vector.broadcast %cst_11 : f32 to vector<16x16xf32>
    %29 = arith.select %27, %13, %28 : vector<16x16xi1>, vector<16x16xf32>
    %cst_12 = arith.constant -1.000000e+30 : f32
    %30 = vector.shape_cast %23 : vector<16x1xi1> to vector<16x1xi1>
    %31 = vector.broadcast %30 : vector<16x1xi1> to vector<16x16xi1>
    %32 = vector.broadcast %cst_12 : f32 to vector<16x16xf32>
    %33 = arith.select %31, %29, %32 : vector<16x16xi1>, vector<16x16xf32>
    %cst_13 = arith.constant dense<0xFF800000> : vector<16xf32>
    %34 = vector.multi_reduction <maximumf>, %33, %cst_13 [1] : vector<16x16xf32> to vector<16xf32>
    %35 = vector.shape_cast %34 : vector<16xf32> to vector<16x1xf32>
    %cst_14 = arith.constant dense<0xFF800000> : vector<16xf32>
    %36 = vector.multi_reduction <maximumf>, %33, %cst_14 [0] : vector<16x16xf32> to vector<16xf32>
    %37 = vector.shape_cast %36 : vector<16xf32> to vector<1x16xf32>
    %c0_15 = arith.constant 0 : index
    %c0_16 = arith.constant 0 : index
    %38 = vector.load %arg8[%c0_15, %c0_16] : memref<16x1xf32, #tpu.memory_space<vmem>>, vector<16x1xf32>
    %39 = arith.index_cast %arg1 : i32 to index
    %c0_17 = arith.constant 0 : index
    %c0_18 = arith.constant 0 : index
    %40 = vector.load %arg11[%39, %c0_17, %c0_18] : memref<2x1x16xf32, #tpu.memory_space<vmem>>, vector<1x1x16xf32>
    %41 = vector.shape_cast %40 : vector<1x1x16xf32> to vector<1x16xf32>
    %42 = arith.maximumf %38, %35 : vector<16x1xf32>
    %43 = arith.maximumf %41, %37 : vector<1x16xf32>
    %44 = arith.subf %38, %42 : vector<16x1xf32>
    %45 = math.exp %44 : vector<16x1xf32>
    %46 = arith.subf %41, %43 : vector<1x16xf32>
    %47 = math.exp %46 : vector<1x16xf32>
    %c0_19 = arith.constant 0 : index
    %c0_20 = arith.constant 0 : index
    %48 = vector.load %arg8[%c0_19, %c0_20] : memref<16x1xf32, #tpu.memory_space<vmem>>, vector<16x1xf32>
    tpu.vector_store %arg8[%c0_19, %c0_20], %42 {strides = array<i32>} : memref<16x1xf32, #tpu.memory_space<vmem>>, vector<16x1xf32>,
    %49 = arith.index_cast %arg1 : i32 to index
    %c0_21 = arith.constant 0 : index
    %c0_22 = arith.constant 0 : index
    %50 = vector.load %arg11[%49, %c0_21, %c0_22] : memref<2x1x16xf32, #tpu.memory_space<vmem>>, vector<1x1x16xf32>
    %51 = vector.shape_cast %50 : vector<1x1x16xf32> to vector<1x16xf32>
    %52 = vector.shape_cast %43 : vector<1x16xf32> to vector<1x1x16xf32>
    tpu.vector_store %arg11[%49, %c0_21, %c0_22], %52 {strides = array<i32>} : memref<2x1x16xf32, #tpu.memory_space<vmem>>, vector<1x1x16xf32>,
    %c0_23 = arith.constant 0 : index
    %c0_24 = arith.constant 0 : index
    %53 = memref.load %arg2[%c0_23, %c0_24] : memref<1x1xf32, #tpu.memory_space<smem>>
    %cst_25 = arith.constant 3.000000e+01 : f32
    %54 = arith.cmpf ole, %53, %cst_25 : f32
    %55 = arith.extui %54 : i1 to i32
    %c0_i32_26 = arith.constant 0 : i32
    %56 = arith.cmpi ne, %55, %c0_i32_26 : i32
    scf.if %56 {
      %71 = vector.broadcast %53 : f32 to vector<16x16xf32>
      %72 = arith.subf %33, %71 : vector<16x16xf32>
      %73 = math.exp %72 : vector<16x16xf32>
      %74 = vector.broadcast %53 : f32 to vector<16x1xf32>
      %75 = arith.subf %74, %42 : vector<16x1xf32>
      %cst_34 = arith.constant 6.400000e+01 : f32
      %76 = vector.broadcast %cst_34 : f32 to vector<16x1xf32>
      %77 = arith.minimumf %75, %76 : vector<16x1xf32>
      %78 = math.exp %77 : vector<16x1xf32>
      %79 = vector.broadcast %53 : f32 to vector<1x16xf32>
      %80 = arith.subf %79, %43 : vector<1x16xf32>
      %cst_35 = arith.constant 6.400000e+01 : f32
      %81 = vector.broadcast %cst_35 : f32 to vector<1x16xf32>
      %82 = arith.minimumf %80, %81 : vector<1x16xf32>
      %83 = math.exp %82 : vector<1x16xf32>
      %c0_36 = arith.constant 0 : index
      %c0_37 = arith.constant 0 : index
      %84 = vector.load %arg9[%c0_36, %c0_37] : memref<16x1xf32, #tpu.memory_space<vmem>>, vector<16x1xf32>
      %85 = arith.mulf %84, %45 : vector<16x1xf32>
      %cst_38 = arith.constant dense<0.000000e+00> : vector<16xf32>
      %86 = vector.multi_reduction <add>, %73, %cst_38 [1] : vector<16x16xf32> to vector<16xf32>
      %87 = vector.shape_cast %86 : vector<16xf32> to vector<16x1xf32>
      %88 = arith.mulf %87, %78 : vector<16x1xf32>
      %89 = arith.addf %85, %88 : vector<16x1xf32>
      %c0_39 = arith.constant 0 : index
      %c0_40 = arith.constant 0 : index
      %90 = vector.load %arg9[%c0_39, %c0_40] : memref<16x1xf32, #tpu.memory_space<vmem>>, vector<16x1xf32>
      tpu.vector_store %arg9[%c0_39, %c0_40], %89 {strides = array<i32>} : memref<16x1xf32, #tpu.memory_space<vmem>>, vector<16x1xf32>,
      %91 = arith.index_cast %arg1 : i32 to index
      %c0_41 = arith.constant 0 : index
      %c0_42 = arith.constant 0 : index
      %92 = vector.load %arg12[%91, %c0_41, %c0_42] : memref<2x1x16xf32, #tpu.memory_space<vmem>>, vector<1x1x16xf32>
      %93 = vector.shape_cast %92 : vector<1x1x16xf32> to vector<1x16xf32>
      %94 = arith.mulf %93, %47 : vector<1x16xf32>
      %cst_43 = arith.constant dense<0.000000e+00> : vector<16xf32>
      %95 = vector.multi_reduction <add>, %73, %cst_43 [0] : vector<16x16xf32> to vector<16xf32>
      %96 = vector.shape_cast %95 : vector<16xf32> to vector<1x16xf32>
      %97 = arith.mulf %96, %83 : vector<1x16xf32>
      %98 = arith.addf %94, %97 : vector<1x16xf32>
      %99 = arith.index_cast %arg1 : i32 to index
      %c0_44 = arith.constant 0 : index
      %c0_45 = arith.constant 0 : index
      %100 = vector.load %arg12[%99, %c0_44, %c0_45] : memref<2x1x16xf32, #tpu.memory_space<vmem>>, vector<1x1x16xf32>
      %101 = vector.shape_cast %100 : vector<1x1x16xf32> to vector<1x16xf32>
      %102 = vector.shape_cast %98 : vector<1x16xf32> to vector<1x1x16xf32>
      tpu.vector_store %arg12[%99, %c0_44, %c0_45], %102 {strides = array<i32>} : memref<2x1x16xf32, #tpu.memory_space<vmem>>, vector<1x1x16xf32>,
    } else {
    }
    %cst_27 = arith.constant 3.000000e+01 : f32
    %57 = arith.cmpf ogt, %53, %cst_27 : f32
    %58 = arith.extui %57 : i1 to i32
    %c0_i32_28 = arith.constant 0 : i32
    %59 = arith.cmpi ne, %58, %c0_i32_28 : i32
    scf.if %59 {
      %c0_34 = arith.constant 0 : index
      %c0_35 = arith.constant 0 : index
      %71 = vector.load %arg9[%c0_34, %c0_35] : memref<16x1xf32, #tpu.memory_space<vmem>>, vector<16x1xf32>
      %72 = arith.mulf %71, %45 : vector<16x1xf32>
      %73 = vector.broadcast %42 : vector<16x1xf32> to vector<16x16xf32>
      %74 = arith.subf %33, %73 : vector<16x16xf32>
      %75 = math.exp %74 : vector<16x16xf32>
      %cst_36 = arith.constant dense<0.000000e+00> : vector<16xf32>
      %76 = vector.multi_reduction <add>, %75, %cst_36 [1] : vector<16x16xf32> to vector<16xf32>
      %77 = vector.shape_cast %76 : vector<16xf32> to vector<16x1xf32>
      %78 = arith.addf %72, %77 : vector<16x1xf32>
      %c0_37 = arith.constant 0 : index
      %c0_38 = arith.constant 0 : index
      %79 = vector.load %arg9[%c0_37, %c0_38] : memref<16x1xf32, #tpu.memory_space<vmem>>, vector<16x1xf32>
      tpu.vector_store %arg9[%c0_37, %c0_38], %78 {strides = array<i32>} : memref<16x1xf32, #tpu.memory_space<vmem>>, vector<16x1xf32>,
      %80 = arith.index_cast %arg1 : i32 to index
      %c0_39 = arith.constant 0 : index
      %c0_40 = arith.constant 0 : index
      %81 = vector.load %arg12[%80, %c0_39, %c0_40] : memref<2x1x16xf32, #tpu.memory_space<vmem>>, vector<1x1x16xf32>
      %82 = vector.shape_cast %81 : vector<1x1x16xf32> to vector<1x16xf32>
      %83 = arith.mulf %82, %47 : vector<1x16xf32>
      %84 = vector.broadcast %43 : vector<1x16xf32> to vector<16x16xf32>
      %85 = arith.subf %33, %84 : vector<16x16xf32>
      %86 = math.exp %85 : vector<16x16xf32>
      %cst_41 = arith.constant dense<0.000000e+00> : vector<16xf32>
      %87 = vector.multi_reduction <add>, %86, %cst_41 [0] : vector<16x16xf32> to vector<16xf32>
      %88 = vector.shape_cast %87 : vector<16xf32> to vector<1x16xf32>
      %89 = arith.addf %83, %88 : vector<1x16xf32>
      %90 = arith.index_cast %arg1 : i32 to index
      %c0_42 = arith.constant 0 : index
      %c0_43 = arith.constant 0 : index
      %91 = vector.load %arg12[%90, %c0_42, %c0_43] : memref<2x1x16xf32, #tpu.memory_space<vmem>>, vector<1x1x16xf32>
      %92 = vector.shape_cast %91 : vector<1x1x16xf32> to vector<1x16xf32>
      %93 = vector.shape_cast %89 : vector<1x16xf32> to vector<1x1x16xf32>
      tpu.vector_store %arg12[%90, %c0_42, %c0_43], %93 {strides = array<i32>} : memref<2x1x16xf32, #tpu.memory_space<vmem>>, vector<1x1x16xf32>,
    } else {
    }
    %60 = arith.cmpi eq, %arg1, %arg0 : i32
    %61 = arith.extui %60 : i1 to i32
    %c0_i32_29 = arith.constant 0 : i32
    %62 = arith.cmpi ne, %61, %c0_i32_29 : i32
    scf.if %62 {
      %71 = tpu.iota {dimensions = array<i32: 0>} : vector<16x1xi32>
      %72 = tpu.iota {dimensions = array<i32: 1>} : vector<1x16xi32>
      %73 = vector.broadcast %71 : vector<16x1xi32> to vector<16x16xi32>
      %74 = vector.broadcast %72 : vector<1x16xi32> to vector<16x16xi32>
      %75 = arith.cmpi eq, %73, %74 : vector<16x16xi32>
      %cst_34 = arith.constant 0.000000e+00 : f32
      %76 = vector.broadcast %cst_34 : f32 to vector<16x16xf32>
      %77 = arith.select %75, %33, %76 : vector<16x16xi1>, vector<16x16xf32>
      %cst_35 = arith.constant dense<0.000000e+00> : vector<16xf32>
      %78 = vector.multi_reduction <add>, %77, %cst_35 [1] : vector<16x16xf32> to vector<16xf32>
      %79 = vector.shape_cast %78 : vector<16xf32> to vector<16x1xf32>
      %c0_36 = arith.constant 0 : index
      %c0_37 = arith.constant 0 : index
      %80 = vector.load %arg10[%c0_36, %c0_37] : memref<16x1xf32, #tpu.memory_space<vmem>>, vector<16x1xf32>
      tpu.vector_store %arg10[%c0_36, %c0_37], %79 {strides = array<i32>} : memref<16x1xf32, #tpu.memory_space<vmem>>, vector<16x1xf32>,
      %cst_38 = arith.constant dense<0.000000e+00> : vector<16xf32>
      %81 = vector.multi_reduction <add>, %77, %cst_38 [0] : vector<16x16xf32> to vector<16xf32>
      %82 = vector.shape_cast %81 : vector<16xf32> to vector<1x16xf32>
      %83 = arith.index_cast %arg1 : i32 to index
      %c0_39 = arith.constant 0 : index
      %c0_40 = arith.constant 0 : index
      %84 = vector.load %arg13[%83, %c0_39, %c0_40] : memref<2x1x16xf32, #tpu.memory_space<vmem>>, vector<1x1x16xf32>
      %85 = vector.shape_cast %84 : vector<1x1x16xf32> to vector<1x16xf32>
      %86 = vector.shape_cast %82 : vector<1x16xf32> to vector<1x1x16xf32>
      tpu.vector_store %arg13[%83, %c0_39, %c0_40], %86 {strides = array<i32>} : memref<2x1x16xf32, #tpu.memory_space<vmem>>, vector<1x1x16xf32>,
    } else {
    }
    %c1_i32 = arith.constant 1 : i32
    %63 = arith.cmpi eq, %arg1, %c1_i32 : i32
    %64 = arith.extui %63 : i1 to i32
    %c0_i32_30 = arith.constant 0 : i32
    %65 = arith.cmpi ne, %64, %c0_i32_30 : i32
    scf.if %65 {
      %c0_34 = arith.constant 0 : index
      %c0_35 = arith.constant 0 : index
      %71 = vector.load %arg8[%c0_34, %c0_35] : memref<16x1xf32, #tpu.memory_space<vmem>>, vector<16x1xf32>
      %c0_36 = arith.constant 0 : index
      %c0_37 = arith.constant 0 : index
      %72 = vector.load %arg9[%c0_36, %c0_37] : memref<16x1xf32, #tpu.memory_space<vmem>>, vector<16x1xf32>
      %73 = math.log %72 : vector<16x1xf32>
      %74 = arith.addf %71, %73 : vector<16x1xf32>
      %c0_38 = arith.constant 0 : index
      %c0_39 = arith.constant 0 : index
      %75 = vector.load %arg14[%c0_38, %c0_39] : memref<1x1xf32, #tpu.memory_space<vmem>>, vector<1x1xf32>
      %c0_40 = arith.constant 0 : index
      %c0_41 = arith.constant 0 : index
      %76 = vector.load %arg10[%c0_40, %c0_41] : memref<16x1xf32, #tpu.memory_space<vmem>>, vector<16x1xf32>
      %77 = arith.subf %74, %76 : vector<16x1xf32>
      %cst_42 = arith.constant 0.000000e+00 : f32
      %78 = vector.broadcast %cst_42 : f32 to vector<16x1xf32>
      %79 = arith.select %23, %77, %78 : vector<16x1xi1>, vector<16x1xf32>
      %80 = vector.shape_cast %79 : vector<16x1xf32> to vector<1x16x1xf32>
      %cst_43 = arith.constant dense<0.000000e+00> : vector<1xf32>
      %81 = vector.multi_reduction <add>, %80, %cst_43 [1, 2] : vector<1x16x1xf32> to vector<1xf32>
      %82 = vector.shape_cast %81 : vector<1xf32> to vector<1x1x1xf32>
      %83 = vector.extract %82[0, 0, 0] : f32 from vector<1x1x1xf32>
      %84 = vector.broadcast %83 : f32 to vector<1x1xf32>
      %85 = arith.addf %75, %84 : vector<1x1xf32>
      %c0_44 = arith.constant 0 : index
      %c0_45 = arith.constant 0 : index
      %86 = vector.load %arg14[%c0_44, %c0_45] : memref<1x1xf32, #tpu.memory_space<vmem>>, vector<1x1xf32>
      tpu.vector_store %arg14[%c0_44, %c0_45], %85 {strides = array<i32>} : memref<1x1xf32, #tpu.memory_space<vmem>>, vector<1x1xf32>,
      %c0_46 = arith.constant 0 : index
      %c0_47 = arith.constant 0 : index
      %87 = vector.load %arg15[%c0_46, %c0_47] : memref<1x1xf32, #tpu.memory_space<vmem>>, vector<1x1xf32>
      %c0_48 = arith.constant 0 : index
      %c0_49 = arith.constant 0 : index
      %88 = vector.load %arg10[%c0_48, %c0_49] : memref<16x1xf32, #tpu.memory_space<vmem>>, vector<16x1xf32>
      %cst_50 = arith.constant 0.000000e+00 : f32
      %89 = vector.broadcast %cst_50 : f32 to vector<16x1xf32>
      %90 = arith.select %23, %88, %89 : vector<16x1xi1>, vector<16x1xf32>
      %91 = vector.shape_cast %90 : vector<16x1xf32> to vector<1x16x1xf32>
      %cst_51 = arith.constant dense<0.000000e+00> : vector<1xf32>
      %92 = vector.multi_reduction <add>, %91, %cst_51 [1, 2] : vector<1x16x1xf32> to vector<1xf32>
      %93 = vector.shape_cast %92 : vector<1xf32> to vector<1x1x1xf32>
      %94 = vector.extract %93[0, 0, 0] : f32 from vector<1x1x1xf32>
      %95 = vector.broadcast %94 : f32 to vector<1x1xf32>
      %96 = arith.addf %87, %95 : vector<1x1xf32>
      %c0_52 = arith.constant 0 : index
      %c0_53 = arith.constant 0 : index
      %97 = vector.load %arg15[%c0_52, %c0_53] : memref<1x1xf32, #tpu.memory_space<vmem>>, vector<1x1xf32>
      tpu.vector_store %arg15[%c0_52, %c0_53], %96 {strides = array<i32>} : memref<1x1xf32, #tpu.memory_space<vmem>>, vector<1x1xf32>,
      %c0_54 = arith.constant 0 : index
      %c0_55 = arith.constant 0 : index
      %98 = vector.load %arg10[%c0_54, %c0_55] : memref<16x1xf32, #tpu.memory_space<vmem>>, vector<16x1xf32>
      %c0_56 = arith.constant 0 : index
      %c0_57 = arith.constant 0 : index
      %99 = vector.load %arg8[%c0_56, %c0_57] : memref<16x1xf32, #tpu.memory_space<vmem>>, vector<16x1xf32>
      %100 = arith.cmpf oge, %98, %99 : vector<16x1xf32>
      %101 = arith.andi %23, %100 : vector<16x1xi1>
      %c0_58 = arith.constant 0 : index
      %c0_59 = arith.constant 0 : index
      %102 = vector.load %arg16[%c0_58, %c0_59] : memref<1x1xf32, #tpu.memory_space<vmem>>, vector<1x1xf32>
      %cst_60 = arith.constant 1.000000e+00 : f32
      %cst_61 = arith.constant 0.000000e+00 : f32
      %103 = vector.broadcast %cst_60 : f32 to vector<16x1xf32>
      %104 = vector.broadcast %cst_61 : f32 to vector<16x1xf32>
      %105 = arith.select %101, %103, %104 : vector<16x1xi1>, vector<16x1xf32>
      %106 = vector.shape_cast %105 : vector<16x1xf32> to vector<1x16x1xf32>
      %cst_62 = arith.constant dense<0.000000e+00> : vector<1xf32>
      %107 = vector.multi_reduction <add>, %106, %cst_62 [1, 2] : vector<1x16x1xf32> to vector<1xf32>
      %108 = vector.shape_cast %107 : vector<1xf32> to vector<1x1x1xf32>
      %109 = vector.extract %108[0, 0, 0] : f32 from vector<1x1x1xf32>
      %110 = vector.broadcast %109 : f32 to vector<1x1xf32>
      %111 = arith.addf %102, %110 : vector<1x1xf32>
      %c0_63 = arith.constant 0 : index
      %c0_64 = arith.constant 0 : index
      %112 = vector.load %arg16[%c0_63, %c0_64] : memref<1x1xf32, #tpu.memory_space<vmem>>, vector<1x1xf32>
      tpu.vector_store %arg16[%c0_63, %c0_64], %111 {strides = array<i32>} : memref<1x1xf32, #tpu.memory_space<vmem>>, vector<1x1xf32>,
    } else {
    }
    %c1_i32_31 = arith.constant 1 : i32
    %66 = arith.cmpi eq, %arg0, %c1_i32_31 : i32
    %c1_i32_32 = arith.constant 1 : i32
    %67 = arith.cmpi eq, %arg1, %c1_i32_32 : i32
    %68 = arith.andi %66, %67 : i1
    %69 = arith.extui %68 : i1 to i32
    %c0_i32_33 = arith.constant 0 : i32
    %70 = arith.cmpi ne, %69, %c0_i32_33 : i32
    scf.if %70 {
      %c0_34 = arith.constant 0 : index
      %c0_35 = arith.constant 0 : index
      %c0_36 = arith.constant 0 : index
      %71 = vector.load %arg11[%c0_34, %c0_35, %c0_36] : memref<2x1x16xf32, #tpu.memory_space<vmem>>, vector<2x1x16xf32>
      %cst_37 = arith.constant -5.000000e+29 : f32
      %72 = vector.broadcast %cst_37 : f32 to vector<2x1x16xf32>
      %73 = arith.cmpf ogt, %71, %72 : vector<2x1x16xf32>
      %c0_38 = arith.constant 0 : index
      %c0_39 = arith.constant 0 : index
      %c0_40 = arith.constant 0 : index
      %74 = vector.load %arg11[%c0_38, %c0_39, %c0_40] : memref<2x1x16xf32, #tpu.memory_space<vmem>>, vector<2x1x16xf32>
      %c0_41 = arith.constant 0 : index
      %c0_42 = arith.constant 0 : index
      %c0_43 = arith.constant 0 : index
      %75 = vector.load %arg12[%c0_41, %c0_42, %c0_43] : memref<2x1x16xf32, #tpu.memory_space<vmem>>, vector<2x1x16xf32>
      %76 = math.log %75 : vector<2x1x16xf32>
      %77 = arith.addf %74, %76 : vector<2x1x16xf32>
      %cst_44 = arith.constant 0.000000e+00 : f32
      %78 = vector.broadcast %cst_44 : f32 to vector<2x1x16xf32>
      %79 = arith.select %73, %77, %78 : vector<2x1x16xi1>, vector<2x1x16xf32>
      %80 = vector.shape_cast %79 : vector<2x1x16xf32> to vector<1x2x1x16xf32>
      %cst_45 = arith.constant dense<0.000000e+00> : vector<1xf32>
      %81 = vector.multi_reduction <add>, %80, %cst_45 [1, 2, 3] : vector<1x2x1x16xf32> to vector<1xf32>
      %82 = vector.shape_cast %81 : vector<1xf32> to vector<1x1x1x1xf32>
      %83 = vector.extract %82[0, 0, 0, 0] : f32 from vector<1x1x1x1xf32>
      %c0_46 = arith.constant 0 : index
      %c0_47 = arith.constant 0 : index
      %c0_48 = arith.constant 0 : index
      %84 = vector.load %arg13[%c0_46, %c0_47, %c0_48] : memref<2x1x16xf32, #tpu.memory_space<vmem>>, vector<2x1x16xf32>
      %c0_49 = arith.constant 0 : index
      %c0_50 = arith.constant 0 : index
      %c0_51 = arith.constant 0 : index
      %85 = vector.load %arg11[%c0_49, %c0_50, %c0_51] : memref<2x1x16xf32, #tpu.memory_space<vmem>>, vector<2x1x16xf32>
      %86 = arith.cmpf oge, %84, %85 : vector<2x1x16xf32>
      %87 = arith.andi %73, %86 : vector<2x1x16xi1>
      %cst_52 = arith.constant 1.000000e+00 : f32
      %cst_53 = arith.constant 0.000000e+00 : f32
      %88 = vector.broadcast %cst_52 : f32 to vector<2x1x16xf32>
      %89 = vector.broadcast %cst_53 : f32 to vector<2x1x16xf32>
      %90 = arith.select %87, %88, %89 : vector<2x1x16xi1>, vector<2x1x16xf32>
      %91 = vector.shape_cast %90 : vector<2x1x16xf32> to vector<1x2x1x16xf32>
      %cst_54 = arith.constant dense<0.000000e+00> : vector<1xf32>
      %92 = vector.multi_reduction <add>, %91, %cst_54 [1, 2, 3] : vector<1x2x1x16xf32> to vector<1xf32>
      %93 = vector.shape_cast %92 : vector<1xf32> to vector<1x1x1x1xf32>
      %94 = vector.extract %93[0, 0, 0, 0] : f32 from vector<1x1x1x1xf32>
      %c0_55 = arith.constant 0 : index
      %c0_56 = arith.constant 0 : index
      %95 = vector.load %arg14[%c0_55, %c0_56] : memref<1x1xf32, #tpu.memory_space<vmem>>, vector<1x1xf32>
      %96 = vector.extract %95[0, 0] : f32 from vector<1x1xf32>
      %cst_57 = arith.constant 0.0416666679 : f32
      %97 = arith.mulf %96, %cst_57 : f32
      %c0_58 = arith.constant 0 : index
      %c0_59 = arith.constant 0 : index
      %98 = vector.load %arg15[%c0_58, %c0_59] : memref<1x1xf32, #tpu.memory_space<vmem>>, vector<1x1xf32>
      %99 = vector.extract %98[0, 0] : f32 from vector<1x1xf32>
      %100 = arith.subf %83, %99 : f32
      %cst_60 = arith.constant 0.0416666679 : f32
      %101 = arith.mulf %100, %cst_60 : f32
      %102 = arith.addf %97, %101 : f32
      %cst_61 = arith.constant 5.000000e-01 : f32
      %103 = arith.mulf %102, %cst_61 : f32
      %c0_62 = arith.constant 0 : index
      %c0_63 = arith.constant 0 : index
      %104 = memref.load %arg5[%c0_62, %c0_63] : memref<1x1xf32, #tpu.memory_space<smem>>
      memref.store %103, %arg5[%c0_62, %c0_63] : memref<1x1xf32, #tpu.memory_space<smem>>
      %c0_64 = arith.constant 0 : index
      %c0_65 = arith.constant 0 : index
      %105 = vector.load %arg16[%c0_64, %c0_65] : memref<1x1xf32, #tpu.memory_space<vmem>>, vector<1x1xf32>
      %106 = vector.extract %105[0, 0] : f32 from vector<1x1xf32>
      %cst_66 = arith.constant 0.0416666679 : f32
      %107 = arith.mulf %106, %cst_66 : f32
      %c0_67 = arith.constant 0 : index
      %c0_68 = arith.constant 0 : index
      %108 = memref.load %arg6[%c0_67, %c0_68] : memref<1x1xf32, #tpu.memory_space<smem>>
      memref.store %107, %arg6[%c0_67, %c0_68] : memref<1x1xf32, #tpu.memory_space<smem>>
      %cst_69 = arith.constant 0.0416666679 : f32
      %109 = arith.mulf %94, %cst_69 : f32
      %c0_70 = arith.constant 0 : index
      %c0_71 = arith.constant 0 : index
      %110 = memref.load %arg7[%c0_70, %c0_71] : memref<1x1xf32, #tpu.memory_space<smem>>
      memref.store %109, %arg7[%c0_70, %c0_71] : memref<1x1xf32, #tpu.memory_space<smem>>
    } else {
    }
    return
  }
  func.func @transform_0(%arg0: i32, %arg1: i32) -> (i32, i32) {
    %c0_i32 = arith.constant 0 : i32
    %c0_i32_0 = arith.constant 0 : i32
    %c0_i32_1 = arith.constant 0 : i32
    return %c0_i32, %c0_i32_0 : i32, i32
  }
  func.func @transform_1(%arg0: i32, %arg1: i32) -> (i32, i32) {
    %c0_i32 = arith.constant 0 : i32
    %c0_i32_0 = arith.constant 0 : i32
    return %arg0, %c0_i32 : i32, i32
  }
  func.func @transform_2(%arg0: i32, %arg1: i32) -> (i32, i32) {
    %c0_i32 = arith.constant 0 : i32
    %c0_i32_0 = arith.constant 0 : i32
    return %arg1, %c0_i32 : i32, i32
  }
  func.func @transform_3(%arg0: i32, %arg1: i32) -> (i32, i32) {
    %c0_i32 = arith.constant 0 : i32
    %c0_i32_0 = arith.constant 0 : i32
    %c0_i32_1 = arith.constant 0 : i32
    return %c0_i32, %c0_i32_0 : i32, i32
  }
  func.func @transform_4(%arg0: i32, %arg1: i32) -> (i32, i32) {
    %c0_i32 = arith.constant 0 : i32
    %c0_i32_0 = arith.constant 0 : i32
    %c0_i32_1 = arith.constant 0 : i32
    return %c0_i32, %c0_i32_0 : i32, i32
  }
  func.func @transform_5(%arg0: i32, %arg1: i32) -> (i32, i32) {
    %c0_i32 = arith.constant 0 : i32
    %c0_i32_0 = arith.constant 0 : i32
    %c0_i32_1 = arith.constant 0 : i32
    return %c0_i32, %c0_i32_0 : i32, i32
  }
}

</mosaic_0001>

<bundles_post_ra>
// kernel: tpu_custom_call.1
= control target key start
LH: loop header
LB: loop body
LE: loop exit
PB: predicated region body
PF: predicated region fallthrough
CT: control target
= control target key end

     0   :  { %s1676_s0 = inlined_call_operand.<no memory space> [shape: f32[1,1], index: 0, kind: input, shape index: {}]   ;;  %s1677_s1 = inlined_call_operand.hbm [shape: bf16[32,128], index: 1, kind: input, shape index: {}]   ;;  %s1678_s2 = inlined_call_operand.hbm [shape: bf16[32,128], index: 2, kind: input, shape index: {}]   ;;  %s1679_s3 = inlined_call_operand.hbm [shape: f32[1,1], index: 3, kind: output, shape index: {0}]   ;;  %s1680_s4 = inlined_call_operand.hbm [shape: f32[1,1], index: 4, kind: output, shape index: {1}]   ;;  %s1681_s5 = inlined_call_operand.hbm [shape: f32[1,1], index: 5, kind: output, shape index: {2}]  }
   0x1   :  { %1686 = sst [smem:[#allocation26_spill]] %s1677_s1 }
   0x2   :  { %1687 = sst [smem:[#allocation27_spill]] %s1681_s5 }
   0x3   :  { %11 = sst [smem:[#allocation11]] %s1676_s0 }
   0x4   :  { %12 = vsyncpa [#allocation13], 0 }
   0x5   :  { %14 = vsyncpa [#allocation13 + $0x1], 0 }
   0x6   :  { %15 = vsyncpa [#allocation16], 0 }
   0x7   :  { %17 = vsyncpa [#allocation16 + $0x1], 0 }
   0x8   :  { %18 = vsyncpa [#allocation14], 0 }
   0x9   :  { %19 = vsyncpa [#allocation19], 0  ;;  %s1315_s20 = smov 0   ;;  %s1317_s21 = smov 0  }
   0xa   :  { %s1319_s22 = smov 0   ;;  %s1321_s23 = smov 0  }
   0xb   :  { %s1323_s24 = smov 0   ;;  %s1325_s25 = smov 0  }
   0xc   :  { %s1327_s26 = smov 0   ;;  %s1329_s0 = smov 0  }
   0xd   :  { %s1331_s27 = smov 0   ;;  %s1333_s28 = smov 0  }
   0xe   :  { %s1335_s29 = smov 0  }
   0xf LB: > { %s1682_s30 = sadd.s32 4294967295, %s1263_s29   ;;  %s37_s6 = sadd.s32 1, %s1259_s28  ;;  %s1263_s29 = sphi %s1335_s29, %s25_s29   ;;  %s1259_s28 = sphi %s1333_s28, %s1711_s28   ;;  %s1255_s27 = sphi %s1331_s27, %s1710_s27   ;;  %s1251_s0 = sphi %s1329_s0, %s1709_s0   ;;  %s1247_s26 = sphi %s1327_s26, %s1708_s26   ;;  %s1243_s25 = sphi %s1325_s25, %s1707_s25   ;;  %s1239_s24 = sphi %s1323_s24, %s1706_s24   ;;  %s1235_s23 = sphi %s1321_s23, %s1705_s23   ;;  %s1231_s22 = sphi %s1319_s22, %s1704_s22   ;;  %s1227_s21 = sphi %s1317_s21, %s1703_s21   ;;  %s1223_s20 = sphi %s1315_s20, %s1702_s20  }
  0x10   : > { %p72_p0 = scmp.ne.s32.totalorder %s1243_s25, %s1239_s24  ;;  %p73_p1 = scmp.eq.s32.totalorder %s1263_s29, 0 }
  0x11   : > { %p78_p2 = scmp.ne.s32.totalorder %s1239_s24, %s1235_s23  ;;  %p1376_p3 = scmp.eq.s32.totalorder %s1682_s30, 0 }
  0x12   : > { %p74_p4 = por %p73_p1, %p72_p0  ;;  %p930_p5 = scmp.lt.s32.totalorder %s1263_s29, 4 }
  0x13   : > { %p1385_p6 = por %p1376_p3, %p78_p2  ;;  %s194_s9 = sand.u32 1, %s1243_s25  }
  0x14   : > { %s856_s10 = sshll.u32 %s194_s9, 3  ;;  %s881_s11 = sshll.u32 %s1259_s28, 7 }
  0x15   : > { %s1690_s1 = sld [smem:[#allocation26_spill]]  ;;  %s198_s15 = scalar_lea.vmem [#allocation12], %s856_s10 }
  0x16   : > { %s205_s16 = sshll.u32 %s198_s15, 4  ;;  %p1396_p7 = pnand %p930_p5, %p74_p4  ;;  %s206_s16 = int_to_ptr.vmem [resolvable:$true] %s205_s16 }
  0x17   : > { %p862_p8 = scmp.ge.s32.totalorder %s1263_s29, 1  ;;  %s195_s18 = scalar_lea.sflag [#allocation13], %s194_s9 }
  0x18   : > { %p1077_p9 = pneg %p1396_p7  ;;  %s1088_s19 = scalar_lea.vmem %s206_s16, 128 }
  0x19   : > { %p1089_p10 = scmp.ne.s32.totalorder %s206_s16, %s1088_s19  ;;  %s1265_s23 = smov [#allocation12]  }
  0x1a   : > { %s1093_s12 = sshll.u32 %s1265_s23, 4  ;;  %s1094_s12 = int_to_ptr.vmem [resolvable:$false] %s1093_s12 }
  0x1b   : > { %s204_s14 = scalar_lea.hbm %s1690_s1, %s881_s11  ;;  %p1091_p11 = pnand %p1089_p10, %p1077_p9 }
  0x1c   : > { %s1095_s10 = scalar_lea.vmem %s1094_s12, 256  ;;  %p1096_p13 = scmp.lt.s32.totalorder %s206_s16, %s1094_s12 }
  0x1d   : > { %p1092_p12 = pneg %p1091_p11  ;;  %p1097_p0 = scmp.lt.s32.totalorder %s1095_s10, %s1088_s19 }
  0x1f   : > { %p1098_p2 = por %p1097_p0, %p1096_p13 }
  0x21   : > { %p1099_p4 = pnand %p1098_p2, %p1092_p12 }
  0x23   : > { %1102 = shalt.err (!%p1099_p4)
}
  0x24   : > { %s1683_s11 = smov 64   ;;  %s1684_s9 = smov 4  }
  0x25   : > { %926 = dma.hbm_to_vmem [thread:$0]  (!%p1396_p7), %s204_s14, 128, %s206_s16, %s195_s18, %s1683_s11, %s1683_s11, %s1684_s9  }
  0x26   : > { %p234_p9 = scmp.lt.s32.totalorder %s1263_s29, 5  ;;  %s65_s15 = sadd.s32 1, %s1243_s25 }
  0x27   : > { %s34_s19 = sadd.s32 1, %s1255_s27  ;;  %s91_s23 = sadd.s32 1, %s1231_s22 }
  0x28   : > { %p1411_p10 = pnand %p862_p8, %p234_p9  ;;  %p35_p11 = scmp.ge.s32.totalorder %s34_s19, 2 }
  0x29   : > { %p98_p12 = scmp.ne.s32.totalorder %s1231_s22, %s1227_s21  ;;  %p104_p13 = scmp.ne.s32.totalorder %s1227_s21, %s1223_s20 }
  0x2a   : > { %s1713_s19 = smov (%p35_p11, %s34_s19), 0  ;;  %s1715_s6 = smov (!%p35_p11, %s37_s6), %s1259_s28 }
  0x2b   : > { %1693 = sst [smem:[#allocation25_spill]] %s1713_s19  ;;  %s88_s14 = ssub.s32 %s1255_s27, %s1713_s19 }
  0x2c   : > { %s215_s16 = sand.u32 1, %s1231_s22   ;;  %p39_p7 = scmp.ge.s32.totalorder %s1715_s6, 2 }
  0x2d   : > { %p89_p8 = scmp.eq.s32.totalorder %s88_s14, 0  ;;  %p1432_p0 = por %p98_p12, %p73_p1 }
  0x2e   : > { %p1438_p2 = por %p104_p13, %p1376_p3  ;;  %s1717_s6 = smov (%p39_p7, %s1715_s6), 0 }
  0x2f   : > { %s1445_s18 = scalar_select %p89_p8, %s1231_s22, %s91_s23  }
  0x30   : > { %s62_s12 = ssub.s32 %s1259_s28, %s1717_s6  ;;  %s859_s10 = sshll.u32 %s215_s16, 3 }
  0x31   : > { %p63_p4 = scmp.eq.s32.totalorder %s62_s12, 0  ;;  %s882_s14 = sshll.u32 %s1255_s27, 7 }
  0x32   : > { %s219_s30 = scalar_lea.vmem [#allocation15], %s859_s10  ;;  %s225_s19 = scalar_lea.hbm %s1678_s2, %s882_s14 }
  0x33   : > { %s226_s11 = sshll.u32 %s219_s30, 4  ;;  %p1460_p1 = pnand %p930_p5, %p1432_p0  ;;  %s227_s11 = int_to_ptr.vmem [resolvable:$true] %s226_s11 }
  0x34   : > { %s1451_s9 = scalar_select %p63_p4, %s1243_s25, %s65_s15  }
  0x35   : > { %s216_s23 = scalar_lea.sflag [#allocation16], %s215_s16  ;;  %p1105_p3 = pneg %p1460_p1 }
  0x36   : > { %s1116_s12 = scalar_lea.vmem %s227_s11, 128  ;;  %s1268_s30 = smov [#allocation15]  }
  0x37   : > { %p1117_p9 = scmp.ne.s32.totalorder %s227_s11, %s1116_s12  ;;  %s1121_s15 = sshll.u32 %s1268_s30, 4  ;;  %s1122_s15 = int_to_ptr.vmem [resolvable:$false] %s1121_s15 }
  0x38   : > { %s1123_s1 = scalar_lea.vmem %s1122_s15, 256  ;;  %p1124_p13 = scmp.lt.s32.totalorder %s227_s11, %s1122_s15 }
  0x39   : > { %p1119_p11 = pnand %p1117_p9, %p1105_p3  ;;  %p1125_p7 = scmp.lt.s32.totalorder %s1123_s1, %s1116_s12 }
  0x3b   : > { %p1120_p12 = pneg %p1119_p11  ;;  %p1126_p8 = por %p1125_p7, %p1124_p13 }
  0x3d   : > { %p1127_p4 = pnand %p1126_p8, %p1120_p12 }
  0x3f   : > { %1130 = shalt.err (!%p1127_p4)
}
  0x40   : > { %s1697_s17 = smov 4   ;;  %s1698_s10 = smov 64  }
  0x41   : > { %929 = dma.hbm_to_vmem [thread:$0]  (!%p1460_p1), %s225_s19, 128, %s227_s11, %s216_s23, %s1698_s10, %s1698_s10, %s1697_s17  }
  0x42   : > { %238 = sbr.rel (%p1411_p10) target bundleno = 1572 (0x624), region = 32  ;;  %s240_s16 = sand.u32 (!%p1411_p10), 1, %s1239_s24  }
  0x43   : > { %s1474_s14 = sshll.u32 (!%p1411_p10), %s240_s16, 3  ;;  %s241_s7 = scalar_lea.sflag (!%p1411_p10), [#allocation13], %s240_s16 }
  0x44   : > { %s244_s12 = scalar_lea.vmem (!%p1411_p10), [#allocation12], %s1474_s14 }
  0x47   : > { %1206 = dma.done.wait (%p1385_p6), %s241_s7, 128  }
  0x48   : > { %1208 = vsyncadd (%p1385_p6), %s241_s7, 4294967168  ;;  %s249_s5 = sand.u32 1, %s1227_s21  }
  0x49   : > { %s1482_s11 = sshll.u32 %s249_s5, 3  ;;  %s250_s13 = scalar_lea.sflag [#allocation16], %s249_s5 }
  0x4a   : > { %s253_s19 = scalar_lea.vmem [#allocation15], %s1482_s11 }
  0x4b   : > { %1210 = dma.done.wait (%p1438_p2), %s250_s13, 128  }
  0x4c   : > { %1212 = vsyncadd (%p1438_p2), %s250_s13, 4294967168  ;;  %p283_p5 = scmp.eq.s32.totalorder %s1251_s0, 0  ;;  %p284_p10 = scmp.eq.s32.totalorder %s1247_s26, 0 }
  0x4e   : > { %p285_p0 = pnand %p284_p10, %p283_p5 }
  0x50   : > { %288 = sbr.rel (%p285_p0) target bundleno = 88 (0x58), region = 44 }
  0x55   : > { %vm289_vm0 = vcmask 0   ;;  %v1269_v0 = vmov 0.0  }
  0x56   : > { %290 = vst.msk [vmem:[#allocation8] sm:$0x1] %vm289_vm0, %v1269_v0  ;;  %291 = vst.msk [vmem:[#allocation9] sm:$0x1] %vm289_vm0, %v1269_v0 }
  0x57   : > { %292 = vst.msk [vmem:[#allocation10] sm:$0x1] %vm289_vm0, %v1269_v0 }
  0x58 PF: > { %p865_p6 = scmp.ne.s32.totalorder %s1247_s26, 0 }
  0x5a   : > { %295 = sbr.rel (%p865_p6) target bundleno = 98 (0x62), region = 48 }
  0x5f   : > { %vm296_vm1 = vcmask 7168   ;;  %v1270_v1 = vmov -inf   ;;  %v1271_v2 = vmov 0.0  }
  0x60   : > { %297 = vst.msk [vmem:[#allocation2] sm:$0xff] %vm296_vm1, %v1270_v1  ;;  %298 = vst.msk [vmem:[#allocation2 + $0x8] sm:$0xff] %vm296_vm1, %v1270_v1 }
  0x61   : > { %299 = vst.msk [vmem:[#allocation3] sm:$0xff] %vm296_vm1, %v1271_v2  ;;  %300 = vst.msk [vmem:[#allocation3 + $0x8] sm:$0xff] %vm296_vm1, %v1271_v2 }
  0x62 PF: > { %p866_p2 = scmp.ne.s32.totalorder %s1251_s0, 0 }
  0x63   : > { %s304_s8 = scalar_lea.vmem (!%p866_p2), [#allocation5], %s1247_s26  ;;  %s307_s20 = scalar_lea.vmem (!%p866_p2), [#allocation6], %s1247_s26 }
  0x64   : > { %303 = sbr.rel (%p866_p2) target bundleno = 107 (0x6b), region = 52 }
  0x69   : > { %vm305_vm2 = vcmask 122880   ;;  %v1272_v3 = vmov -inf   ;;  %v1273_v4 = vmov 0.0  }
  0x6a   : > { %306 = vst.msk [vmem:[%s304_s8] sm:$0x1] %vm305_vm2, %v1272_v3  ;;  %308 = vst.msk [vmem:[%s307_s20] sm:$0x1] %vm305_vm2, %v1273_v4 }
  0x6b PF: > { %v1040_v5 = vld [vmem:[%s253_s19] sm:$0xff]   ;;  %v1274_v6 = vmov 0.0   ;;  %vm1275_vm3 = vmmov 0   ;;  %v1041_v7 = vld [vmem:[%s244_s12] sm:$0xff]   ;;  %v367_v8 = vlaneseq  ;;  %s870_s23 = sshll.u32 %s1247_s26, 4  ;;  %s869_s30 = sshll.u32 %s1251_s0, 4 }
  0x6c   : > { %885 = vmatprep.subr.bf16.mxu0 %v1274_v6  ;;  %887 = vmatprep.mubr.msk.bf16.mxu0 %vm1275_vm3, %v1274_v6  ;;  %v376_v10 = vstv %s870_s23  ;;  %v370_v12 = vstv %s869_s30  ;;  %vm391_vm6 = vcmask 130048   ;;  %s1529_s15 = sld [smem:[#allocation11]]  ;;  %s407_s1 = scalar_lea.vmem [#allocation5], %s1247_s26  ;;  %vm424_vm8 = vcmask 122880   ;;  %v405_v39 = vld [vmem:[#allocation2] sm:$0xff]  ;;  %v406_v42 = vld [vmem:[#allocation2 + $0x8] sm:$0xff] }
  0x6d   : > { %886 = vmatpush3.bf16.xpose.msra.mxu0 %v1040_v5  ;;  %v1501_v9 = vand.u32 127, %v367_v8  ;;  %v1503_v11 = vshrl.u32 %v367_v8, 7  ;;  %vm421_vm9 = vcmask 7168  }
  0x6f   : > { %v377_v13 = vadd.s32 %v376_v10, %v1501_v9  ;;  %v1507_v14 = vadd.s32 %v370_v12, %v1503_v11  ;;  %v1510_v15 = vadd.s32 8, %v1503_v11 }
  0x71   : > { %vm380_vm4 = vcmp.lt.s32.totalorder %v377_v13, 24  ;;  %vm378_vm5 = vcmp.lt.s32.totalorder %v1507_v14, 24  ;;  %v1514_v16 = vadd.s32 %v370_v12, %v1510_v15  ;;  %v408_v33 = vld [vmem:[%s407_s1] sm:$0x1] }
  0x72   : > { %p427_p1 = scmp.le.f32.partialorder %s1529_s15, 30.0 }
  0x73   : > { %vm379_vm7 = vcmp.lt.s32.totalorder %v1514_v16, 24  ;;  %v431_v51 = vstv (%p427_p1), %s1529_s15  ;;  %s466_s17 = scalar_lea.vmem (%p427_p1), [#allocation6], %s1247_s26 }
  0x74   : > { %888 = vmatmul.mubr.bf16.vlgmr.msra.gmra.mxu0 %v1041_v7  ;;  %v467_v4 = vld [vmem:[%s466_s17] sm:$0x1] (%p427_p1) }
 0x134   : > { %v359_v17 = vpop.f32.mrf.mxu0 }
 0x135   : > { %v383_v18 = vsel %vm380_vm4, %v359_v17, -1e+30 }
 0x136   : > { %v889_v19 = vpop.f32.mrf.mxu0  ;;  %v1518_v20 = vsel %vm378_vm5, %v383_v18, -1e+30 }
 0x137   : > { %v392_v21 = vsel %vm391_vm6, %v1518_v20, -inf  ;;  %v432_v52 = vsub.f32 (%p427_p1), %v1518_v20, %v431_v51 }
 0x138   : > { %393 = vmax.xlane.f32.xlu0 %v392_v21  ;;  %v362_v22 = vpop.f32.mrf.mxu0 }
 0x139   : > { %v384_v23 = vsel %vm380_vm4, %v362_v22, -1e+30  ;;  %v434_v54 = vmul.f32 (%p427_p1), 1.442695, %v432_v52 }
 0x13a   : > { %v890_v24 = vpop.f32.mrf.mxu0  ;;  %v1525_v25 = vsel %vm379_vm7, %v384_v23, -1e+30  ;;  %v450_v23 = vld [vmem:[#allocation3] sm:$0xff] (%p427_p1) }
 0x13b   : > { %v395_v26 = vsel %vm391_vm6, %v1525_v25, -inf  ;;  %v433_v53 = vsub.f32 (%p427_p1), %v1525_v25, %v431_v51 }
 0x13c   : > { %396 = vmax.xlane.f32.xlu0 %v395_v26  ;;  %v398_v27 = vmax.f32 %v392_v21, %v395_v26 }
 0x13d   : > { %v436_v55 = vmul.f32 (%p427_p1), 1.442695, %v433_v53 }
 0x13e   : > { %v399_v28 = vrot.slane %v398_v27, 4 }
 0x140   : > { %v400_v29 = vmax.f32 %v398_v27, %v399_v28  ;;  %v451_v28 = vld [vmem:[#allocation3 + $0x8] sm:$0xff] (%p427_p1) }
 0x142   : > { %v401_v30 = vrot.slane %v400_v29, 2 }
 0x144   : > { %v402_v31 = vmax.f32 %v400_v29, %v401_v30 }
 0x146   : > { %v403_v32 = vrot.slane %v402_v31, 1 }
 0x148   : > { %v404_v34 = vmax.f32 %v402_v31, %v403_v32 }
 0x14a   : > { %v1532_v35 = vmax.f32 %v408_v33, %v404_v34 }
 0x14c   : > { %v418_v36 = vsub.f32 %v408_v33, %v1532_v35  ;;  %425 = vst.msk [vmem:[%s407_s1] sm:$0x1] %vm424_vm8, %v1532_v35  ;;  %v446_v56 = vsub.f32 (%p427_p1), %v431_v51, %v1532_v35 }
 0x14e   : > { %v419_v37 = vmul.f32 1.442695, %v418_v36  ;;  %v447_v57 = vmin.f32 (%p427_p1), %v446_v56, 64.0 }
 0x150   : > { %1042 = vpow2.f32 %v419_v37  ;;  %v448_v58 = vmul.f32 (%p427_p1), 1.442695, %v447_v57 }
 0x15d   : > { %v1538_v38 = vpop.eup %1042 }
 0x15e   : > { %v468_v7 = vmul.f32 (%p427_p1), %v1538_v38, %v467_v4 }
 0x1c1   : > { %v394_v40 = vpop.xlane.xlu0 %393 }
 0x1c2   : > { %v1540_v41 = vmax.f32 %v405_v39, %v394_v40 }
 0x1c4   : > { %v412_v43 = vsub.f32 %v405_v39, %v1540_v41  ;;  %422 = vst.msk [vmem:[#allocation2] sm:$0xff] %vm421_vm9, %v1540_v41  ;;  %v438_v13 = vsub.f32 (%p427_p1), %v431_v51, %v1540_v41 }
 0x1c5   : > { %v397_v44 = vpop.xlane.xlu0 %396 }
 0x1c6   : > { %v414_v45 = vmul.f32 1.442695, %v412_v43  ;;  %v1545_v46 = vmax.f32 %v406_v42, %v397_v44  ;;  %v440_v17 = vmin.f32 (%p427_p1), %v438_v13, 64.0 }
 0x1c8   : > { %1044 = vpow2.f32 %v414_v45  ;;  %v413_v47 = vsub.f32 %v406_v42, %v1545_v46  ;;  %423 = vst.msk [vmem:[#allocation2 + $0x8] sm:$0xff] %vm421_vm9, %v1545_v46  ;;  %v439_v18 = vsub.f32 (%p427_p1), %v431_v51, %v1545_v46  ;;  %v442_v19 = vmul.f32 (%p427_p1), 1.442695, %v440_v17 }
 0x1ca   : > { %v416_v48 = vmul.f32 1.442695, %v413_v47  ;;  %v441_v21 = vmin.f32 (%p427_p1), %v439_v18, 64.0 }
 0x1cc   : > { %1046 = vpow2.f32 %v416_v48  ;;  %v444_v22 = vmul.f32 (%p427_p1), 1.442695, %v441_v21 }
 0x1cd   : > { %1048 = vpow2.f32 (%p427_p1), %v434_v54 }
 0x1ce   : > { %1050 = vpow2.f32 (%p427_p1), %v436_v55 }
 0x1cf   : > { %1052 = vpow2.f32 (%p427_p1), %v448_v58 }
 0x1d0   : > { %1054 = vpow2.f32 (%p427_p1), %v442_v19 }
 0x1d1   : > { %1056 = vpow2.f32 (%p427_p1), %v444_v22 }
 0x1d5   : > { %v1550_v49 = vpop.eup %1044  ;;  %430 = sbr.rel (!%p427_p1) target bundleno = 623 (0x26f), region = 56 }
 0x1d6   : > { %v452_v26 = vmul.f32 (%p427_p1), %v1550_v49, %v450_v23 }
 0x1d9   : > { %v1552_v50 = vpop.eup %1046 }
 0x1da   : > { %v1049_v59 = vpop.eup %1048  ;;  %v453_v32 = vmul.f32 %v1552_v50, %v451_v28 }
 0x1db   : > { %v1051_v60 = vpop.eup %1050  ;;  %v454_v61 = vsel %vm391_vm6, %v1049_v59, 0.0 }
 0x1dc   : > { %455 = vadd.xlane.f32.xlu0 %v454_v61  ;;  %v457_v62 = vsel %vm391_vm6, %v1051_v60, 0.0  ;;  %v1053_v6 = vpop.eup %1052 }
 0x1dd   : > { %v469_v63 = vadd.f32 %v457_v62, %v454_v61  ;;  %v1055_v24 = vpop.eup %1054 }
 0x1de   : > { %v1057_v30 = vpop.eup %1056 }
 0x1df   : > { %v470_v0 = vrot.slane %v469_v63, 4 }
 0x1e0   : > { %458 = vadd.xlane.f32.xlu0 %v457_v62 }
 0x1e1   : > { %v471_v1 = vadd.f32 %v470_v0, %v469_v63 }
 0x1e3   : > { %v472_v2 = vrot.slane %v471_v1, 2 }
 0x1e5   : > { %v473_v3 = vadd.f32 %v472_v2, %v471_v1 }
 0x1e7   : > { %v474_v5 = vrot.slane %v473_v3, 1 }
 0x1e9   : > { %v475_v8 = vadd.f32 %v474_v5, %v473_v3 }
 0x1eb   : > { %v476_v10 = vmul.f32 %v1053_v6, %v475_v8 }
 0x1ed   : > { %v477_v12 = vadd.f32 %v476_v10, %v468_v7 }
 0x1ef   : > { %478 = vst.msk [vmem:[%s466_s17] sm:$0x1] %vm424_vm8, %v477_v12 }
 0x265   : > { %v456_v27 = vpop.xlane.xlu0 %455 }
 0x266   : > { %v460_v29 = vmul.f32 %v1055_v24, %v456_v27 }
 0x268   : > { %v462_v31 = vadd.f32 %v460_v29, %v452_v26 }
 0x269   : > { %v459_v33 = vpop.xlane.xlu0 %458 }
 0x26a   : > { %464 = vst.msk [vmem:[#allocation3] sm:$0xff] %vm421_vm9, %v462_v31  ;;  %v461_v34 = vmul.f32 %v1057_v30, %v459_v33 }
 0x26c   : > { %v463_v36 = vadd.f32 %v461_v34, %v453_v32 }
 0x26e   : > { %465 = vst.msk [vmem:[#allocation3 + $0x8] sm:$0xff] %vm421_vm9, %v463_v36 }
 0x26f PF: > { %p479_p3 = scmp.gt.f32.partialorder %s1529_s15, 30.0 }
 0x270   : > { %v1276_v37 = vmov (%p479_p3), 0   ;;  %v519_v39 = vsub.s32 (%p479_p3), 0, %v1503_v11  ;;  %s513_s10 = scalar_lea.vmem (%p479_p3), [#allocation6], %s1247_s26 }
 0x271   : > { %482 = sbr.rel (!%p479_p3) target bundleno = 914 (0x392), region = 60  ;;  %1058 = vset.pattern.permute.xlu0 (%p479_p3), %v1276_v37  ;;  %v514_v1 = vld [vmem:[%s513_s10] sm:$0x1] (%p479_p3)  ;;  %v483_v6 = vld [vmem:[#allocation3] sm:$0xff] (%p479_p3) }
 0x272   : > { %489 = vperm.xlu0 (%p479_p3), %1058, %v1540_v41   ;;  %v520_v40 = vrot.slane (%p479_p3), %v1532_v35, %v519_v39  ;;  %v515_v2 = vmul.f32 (%p479_p3), %v1538_v38, %v514_v1  ;;  %v485_v7 = vmul.f32 (%p479_p3), %v1550_v49, %v483_v6 }
 0x274   : > { %v522_v44 = vsub.f32 (%p479_p3), %v1518_v20, %v520_v40  ;;  %v523_v45 = vsub.f32 (%p479_p3), %v1525_v25, %v520_v40 }
 0x275   : > { %v484_v8 = vld [vmem:[#allocation3 + $0x8] sm:$0xff] (%p479_p3) }
 0x276   : > { %494 = vperm.xlu0 %1058, %v1545_v46   ;;  %v524_v48 = vmul.f32 1.442695, %v522_v44  ;;  %v526_v51 = vmul.f32 1.442695, %v523_v45  ;;  %v486_v13 = vmul.f32 %v1552_v50, %v484_v8 }
 0x2ed   : > { %v490_v42 = vpop.permute.xlu0 %489 }
 0x2ee   : > { %v497_v43 = vsub.f32 %v1518_v20, %v490_v42 }
 0x2f0   : > { %v499_v47 = vmul.f32 1.442695, %v497_v43 }
 0x2f1   : > { %v495_v52 = vpop.permute.xlu0 %494 }
 0x2f2   : > { %1059 = vpow2.f32 %v499_v47  ;;  %v498_v41 = vsub.f32 %v1525_v25, %v495_v52 }
 0x2f3   : > { %1061 = vpow2.f32 %v524_v48 }
 0x2f4   : > { %v501_v46 = vmul.f32 1.442695, %v498_v41  ;;  %1063 = vpow2.f32 %v526_v51 }
 0x2f6   : > { %1065 = vpow2.f32 %v501_v46 }
 0x2ff   : > { %v1060_v35 = vpop.eup %1059 }
 0x300   : > { %v1062_v53 = vpop.eup %1061  ;;  %v503_v54 = vsel %vm391_vm6, %v1060_v35, 0.0 }
 0x301   : > { %v1064_v55 = vpop.eup %1063  ;;  %504 = vadd.xlane.f32.xlu1 %v503_v54  ;;  %v528_v56 = vsel %vm391_vm6, %v1062_v53, 0.0 }
 0x302   : > { %v529_v57 = vsel %vm391_vm6, %v1064_v55, 0.0 }
 0x303   : > { %v1066_v58 = vpop.eup %1065  ;;  %v530_v59 = vadd.f32 %v529_v57, %v528_v56 }
 0x304   : > { %v506_v60 = vsel %vm391_vm6, %v1066_v58, 0.0 }
 0x305   : > { %507 = vadd.xlane.f32.xlu1 %v506_v60  ;;  %v531_v61 = vrot.slane %v530_v59, 4 }
 0x307   : > { %v532_v62 = vadd.f32 %v531_v61, %v530_v59 }
 0x309   : > { %v533_v63 = vrot.slane %v532_v62, 2 }
 0x30b   : > { %v534_v0 = vadd.f32 %v533_v63, %v532_v62 }
 0x30d   : > { %v535_v3 = vrot.slane %v534_v0, 1 }
 0x30f   : > { %v536_v4 = vadd.f32 %v535_v3, %v534_v0 }
 0x311   : > { %v537_v5 = vadd.f32 %v536_v4, %v515_v2 }
 0x313   : > { %538 = vst.msk [vmem:[%s513_s10] sm:$0x1] %vm424_vm8, %v537_v5 }
 0x38a   : > { %v505_v10 = vpop.xlane.xlu1 %504 }
 0x38b   : > { %v509_v12 = vadd.f32 %v505_v10, %v485_v7 }
 0x38d   : > { %511 = vst.msk [vmem:[#allocation3] sm:$0xff] %vm421_vm9, %v509_v12 }
 0x38e   : > { %v508_v17 = vpop.xlane.xlu1 %507 }
 0x38f   : > { %v510_v18 = vadd.f32 %v508_v17, %v486_v13 }
 0x391   : > { %512 = vst.msk [vmem:[#allocation3 + $0x8] sm:$0xff] %vm421_vm9, %v510_v18 }
 0x392 PF: > { %p871_p9 = scmp.ne.s32.totalorder %s1247_s26, %s1251_s0 }
 0x393   : > { %s562_s16 = scalar_lea.vmem (!%p871_p9), [#allocation7], %s1247_s26 }
 0x394   : > { %542 = sbr.rel (%p871_p9) target bundleno = 1067 (0x42b), region = 64 }
 0x399   : > { %vm543_vm10 = vcmp.eq.s32.totalorder %v1503_v11, %v1501_v9  ;;  %vm544_vm11 = vcmp.eq.s32.totalorder %v1510_v15, %v1501_v9 }
 0x39a   : > { %v545_v38 = vsel %vm543_vm10, %v1518_v20, 0.0  ;;  %v546_v49 = vsel %vm544_vm11, %v1525_v25, 0.0 }
 0x39b   : > { %v547_v50 = vsel %vm391_vm6, %v545_v38, 0.0  ;;  %v550_v19 = vsel %vm391_vm6, %v546_v49, 0.0 }
 0x39c   : > { %548 = vadd.xlane.f32.xlu0 %v547_v50  ;;  %v555_v21 = vadd.f32 %v550_v19, %v547_v50 }
 0x39e   : > { %v556_v22 = vrot.slane %v555_v21, 4 }
 0x3a0   : > { %551 = vadd.xlane.f32.xlu0 %v550_v19  ;;  %v557_v23 = vadd.f32 %v556_v22, %v555_v21 }
 0x3a2   : > { %v558_v24 = vrot.slane %v557_v23, 2 }
 0x3a4   : > { %v559_v26 = vadd.f32 %v558_v24, %v557_v23 }
 0x3a6   : > { %v560_v27 = vrot.slane %v559_v26, 1 }
 0x3a8   : > { %v561_v11 = vadd.f32 %v560_v27, %v559_v26 }
 0x3aa   : > { %563 = vst.msk [vmem:[%s562_s16] sm:$0x1] %vm424_vm8, %v561_v11 }
 0x425   : > { %v549_v9 = vpop.xlane.xlu0 %548 }
 0x426   : > { %553 = vst.msk [vmem:[#allocation4] sm:$0xff] %vm421_vm9, %v549_v9 }
 0x429   : > { %v552_v15 = vpop.xlane.xlu0 %551 }
 0x42a   : > { %554 = vst.msk [vmem:[#allocation4 + $0x8] sm:$0xff] %vm421_vm9, %v552_v15 }
 0x42b PF: > { %p564_p11 = scmp.eq.s32.totalorder %s1247_s26, 1  ;;  %p872_p12 = scmp.ne.s32.totalorder %s1247_s26, 1 }
 0x42d   : > { %567 = sbr.rel (%p872_p12) target bundleno = 1309 (0x51d), region = 68 }
 0x432   : > { %v621_v20 = vld [vmem:[#allocation4] sm:$0xff]  ;;  %v622_v25 = vld [vmem:[#allocation4 + $0x8] sm:$0xff]  ;;  %v570_v30 = vld [vmem:[#allocation3] sm:$0xff]  ;;  %v1277_v32 = vmov 0.0   ;;  %vm599_vm0 = vcmask 0  }
 0x433   : > { %v623_v28 = vld [vmem:[#allocation2] sm:$0xff]  ;;  %v624_v29 = vld [vmem:[#allocation2 + $0x8] sm:$0xff]  ;;  %v571_v31 = vld [vmem:[#allocation3 + $0x8] sm:$0xff]  ;;  %1067 = vlog2.f32 %v570_v30  ;;  %v604_v52 = vsel %vm378_vm5, %v621_v20, 0.0  ;;  %v605_v41 = vsel %vm379_vm7, %v622_v25, 0.0 }
 0x434   : > { %vm625_vm12 = vcmp.ge.f32.partialorder %v621_v20, %v623_v28  ;;  %vm626_vm13 = vcmp.ge.f32.partialorder %v622_v25, %v624_v29  ;;  %1069 = vlog2.f32 %v571_v31  ;;  %v606_v55 = vsel %vm421_vm9, %v604_v52, 0.0  ;;  %v578_v38 = vld [vmem:[#allocation8] sm:$0x1]  ;;  %v601_v19 = vld [vmem:[#allocation9] sm:$0x1] }
 0x435   : > { %vm627_vm14 = vmand %vm378_vm5, %vm625_vm12  ;;  %v607_v56 = vsel %vm421_vm9, %v605_v41, 0.0  ;;  %v629_v21 = vld [vmem:[#allocation10] sm:$0x1] }
 0x436   : > { %vm628_vm15 = vmand %vm379_vm7, %vm626_vm13  ;;  %v630_v33 = vsel %vm627_vm14, 1.0, %v1277_v32  ;;  %v608_v58 = vadd.f32 %v607_v56, %v606_v55 }
 0x437   : > { %v631_v34 = vsel %vm628_vm15, 1.0, %v1277_v32  ;;  %v632_v36 = vsel %vm421_vm9, %v630_v33, 0.0 }
 0x438   : > { %v633_v37 = vsel %vm421_vm9, %v631_v34, 0.0 }
 0x439   : > { %v634_v39 = vadd.f32 %v633_v37, %v632_v36 }
 0x43b   : > { %635 = vadd.xlane.f32.xlu1 %v634_v39 }
 0x440   : > { %v1068_v40 = vpop.eup %1067 }
 0x441   : > { %v1070_v42 = vpop.eup %1069  ;;  %v573_v43 = vmul.f32 0.6931472, %v1068_v40 }
 0x442   : > { %v575_v44 = vmul.f32 0.6931472, %v1070_v42 }
 0x443   : > { %v576_v45 = vadd.f32 %v623_v28, %v573_v43 }
 0x444   : > { %v577_v47 = vadd.f32 %v624_v29, %v575_v44 }
 0x445   : > { %v581_v48 = vsub.f32 %v576_v45, %v621_v20 }
 0x446   : > { %v582_v51 = vsub.f32 %v577_v47, %v622_v25 }
 0x447   : > { %v583_v46 = vsel %vm378_vm5, %v581_v48, 0.0 }
 0x448   : > { %v584_v35 = vsel %vm379_vm7, %v582_v51, 0.0  ;;  %v585_v53 = vsel %vm421_vm9, %v583_v46, 0.0 }
 0x449   : > { %v586_v54 = vsel %vm421_vm9, %v584_v35, 0.0 }
 0x44a   : > { %v587_v57 = vadd.f32 %v586_v54, %v585_v53 }
 0x44c   : > { %588 = vadd.xlane.f32.xlu0 %v587_v57 }
 0x450   : > { %609 = vadd.xlane.f32.xlu0 %v608_v58 }
 0x4c4   : > { %v636_v59 = vpop.xlane.xlu1 %635 }
 0x4c5   : > { %v637_v60 = vrot.slane %v636_v59, 4 }
 0x4c7   : > { %v638_v61 = vadd.f32 %v637_v60, %v636_v59 }
 0x4c9   : > { %v639_v16 = vrot.slane %v638_v61, 2 }
 0x4cb   : > { %v640_v5 = vadd.f32 %v639_v16, %v638_v61 }
 0x4cd   : > { %v641_v12 = vrot.slane %v640_v5, 1 }
 0x4cf   : > { %v642_v18 = vadd.f32 %v641_v12, %v640_v5 }
 0x4d5   : > { %v589_v14 = vpop.xlane.xlu0 %588 }
 0x4d6   : > { %v590_v62 = vrot.slane %v589_v14, 4 }
 0x4d8   : > { %v591_v63 = vadd.f32 %v590_v62, %v589_v14 }
 0x4d9   : > { %v610_v0 = vpop.xlane.xlu0 %609 }
 0x4da   : > { %v592_v1 = vrot.slane %v591_v63, 2  ;;  %v611_v2 = vrot.slane %v610_v0, 4 }
 0x4dc   : > { %v612_v3 = vadd.f32 %v611_v2, %v610_v0  ;;  %v593_v4 = vadd.f32 %v592_v1, %v591_v63 }
 0x4de   : > { %v613_v6 = vrot.slane %v612_v3, 2  ;;  %v594_v7 = vrot.slane %v593_v4, 1 }
 0x4e0   : > { %v614_v8 = vadd.f32 %v613_v6, %v612_v3  ;;  %v595_v10 = vadd.f32 %v594_v7, %v593_v4 }
 0x4e2   : > { %891 = vpush %v595_v10  ;;  %v615_v13 = vrot.slane %v614_v8, 1 }
 0x4e4   : > { %v616_v17 = vadd.f32 %v615_v13, %v614_v8 }
 0x4e6   : > { %893 = vpush %v616_v17 }
 0x4e7   : > { %895 = vpush %v642_v18 }
 0x513   : > { %s892_s14 = spop %891 }
 0x514   : > { %v597_v49 = vstv %s892_s14 }
 0x515   : > { %v598_v50 = vadd.f32 %v597_v49, %v578_v38 }
 0x517   : > { %600 = vst.msk [vmem:[#allocation8] sm:$0x1] %vm599_vm0, %v598_v50  ;;  %s894_s7 = spop %893 }
 0x518   : > { %v618_v22 = vstv %s894_s7  ;;  %s896_s12 = spop %895 }
 0x519   : > { %v619_v23 = vadd.f32 %v618_v22, %v601_v19  ;;  %v644_v24 = vstv %s896_s12 }
 0x51a   : > { %v645_v26 = vadd.f32 %v644_v24, %v629_v21 }
 0x51b   : > { %620 = vst.msk [vmem:[#allocation9] sm:$0x1] %vm599_vm0, %v619_v23 }
 0x51c   : > { %646 = vst.msk [vmem:[#allocation10] sm:$0x1] %vm599_vm0, %v645_v26 }
 0x51d PF: > { %p647_p13 = scmp.eq.s32.totalorder %s1251_s0, 1 }
 0x51f   : > { %p648_p7 = pnand %p647_p13, %p564_p11 }
 0x521   : > { %651 = sbr.rel (%p648_p7) target bundleno = 1558 (0x616), region = 72 }
 0x526   : > { %v656_v27 = vld [vmem:[#allocation6] sm:$0x1]  ;;  %v657_v11 = vld [vmem:[#allocation6 + $0x1] sm:$0x1]  ;;  %v678_v9 = vld [vmem:[#allocation7] sm:$0x1] }
 0x527   : > { %1071 = vlog2.f32 %v656_v27  ;;  %v679_v15 = vld [vmem:[#allocation7 + $0x1] sm:$0x1]  ;;  %v652_v20 = vld [vmem:[#allocation5] sm:$0x1]  ;;  %v653_v25 = vld [vmem:[#allocation5 + $0x1] sm:$0x1] }
 0x528   : > { %1073 = vlog2.f32 %v657_v11  ;;  %vm680_vm1 = vcmp.ge.f32.partialorder %v678_v9, %v652_v20  ;;  %vm681_vm2 = vcmp.ge.f32.partialorder %v679_v15, %v653_v25  ;;  %vm654_vm3 = vcmp.gt.f32.partialorder %v652_v20, -5e+29  ;;  %v698_v14 = vld [vmem:[#allocation8] sm:$0x1]  ;;  %v701_v62 = vld [vmem:[#allocation9] sm:$0x1] }
 0x529   : > { %vm655_vm4 = vcmp.gt.f32.partialorder %v653_v25, -5e+29  ;;  %vm682_vm5 = vmand %vm654_vm3, %vm680_vm1  ;;  %v1278_v34 = vmov 0.0   ;;  %v709_v63 = vld [vmem:[#allocation10] sm:$0x1] }
 0x52a   : > { %vm683_vm6 = vmand %vm655_vm4, %vm681_vm2  ;;  %v684_v36 = vsel %vm682_vm5, 1.0, %v1278_v34 }
 0x52b   : > { %v685_v37 = vsel %vm683_vm6, 1.0, %v1278_v34  ;;  %v686_v44 = vsel %vm424_vm8, %v684_v36, 0.0 }
 0x52c   : > { %v687_v45 = vsel %vm424_vm8, %v685_v37, 0.0 }
 0x52d   : > { %v688_v48 = vadd.f32 %v687_v45, %v686_v44 }
 0x534   : > { %v1072_v28 = vpop.eup %1071 }
 0x535   : > { %v1074_v29 = vpop.eup %1073  ;;  %v659_v30 = vmul.f32 0.6931472, %v1072_v28 }
 0x536   : > { %v661_v31 = vmul.f32 0.6931472, %v1074_v29 }
 0x537   : > { %v662_v32 = vadd.f32 %v659_v30, %v652_v20 }
 0x538   : > { %v663_v33 = vadd.f32 %v661_v31, %v653_v25 }
 0x539   : > { %v664_v39 = vsel %vm654_vm3, %v662_v32, 0.0 }
 0x53a   : > { %v665_v40 = vsel %vm655_vm4, %v663_v33, 0.0  ;;  %v666_v42 = vsel %vm424_vm8, %v664_v39, 0.0 }
 0x53b   : > { %v667_v43 = vsel %vm424_vm8, %v665_v40, 0.0 }
 0x53c   : > { %v668_v47 = vadd.f32 %v667_v43, %v666_v42 }
 0x53e   : > { %669 = vadd.xlane.f32.xlu0 %v668_v47 }
 0x542   : > { %689 = vadd.xlane.f32.xlu0 %v688_v48 }
 0x5c7   : > { %v670_v51 = vpop.xlane.xlu0 %669 }
 0x5c8   : > { %v671_v52 = vrot.slane %v670_v51, 4 }
 0x5ca   : > { %v672_v41 = vadd.f32 %v671_v52, %v670_v51 }
 0x5cb   : > { %v690_v46 = vpop.xlane.xlu0 %689 }
 0x5cc   : > { %v673_v35 = vrot.slane %v672_v41, 2  ;;  %v691_v53 = vrot.slane %v690_v46, 4 }
 0x5ce   : > { %v692_v54 = vadd.f32 %v691_v53, %v690_v46  ;;  %v674_v55 = vadd.f32 %v673_v35, %v672_v41 }
 0x5d0   : > { %v693_v56 = vrot.slane %v692_v54, 2  ;;  %v675_v57 = vrot.slane %v674_v55, 1 }
 0x5d2   : > { %v694_v58 = vadd.f32 %v693_v56, %v692_v54  ;;  %v676_v59 = vadd.f32 %v675_v57, %v674_v55 }
 0x5d4   : > { %897 = vpush %v676_v59  ;;  %v695_v60 = vrot.slane %v694_v58, 1 }
 0x5d6   : > { %v696_v61 = vadd.f32 %v695_v60, %v694_v58 }
 0x5d8   : > { %899 = vpush %v696_v61 }
 0x5d9   : > { %901 = vpush %v698_v14 }
 0x5da   : > { %903 = vpush %v701_v62 }
 0x5db   : > { %905 = vpush %v709_v63 }
 0x605   : > { %s898_s26 = spop %897 }
 0x609   : > { %s900_s0 = spop %899 }
 0x60a   : > { %s714_s5 = smul.f32 0.041666668, %s900_s0  ;;  %s902_s11 = spop %901 }
 0x60b   : > { %s904_s13 = spop %903  ;;  %s700_s23 = smul.f32 0.041666668, %s902_s11 }
 0x60c   : > { %716 = sst [smem:[#allocation20]] %s714_s5  ;;  %s906_s19 = spop %905 }
 0x60d   : > { %s703_s8 = ssub.f32 %s898_s26, %s904_s13  ;;  %s711_s20 = smul.f32 0.041666668, %s906_s19 }
 0x60f   : > { %s704_s30 = smul.f32 0.041666668, %s703_s8  ;;  %713 = sst [smem:[#allocation18]] %s711_s20 }
 0x611   : > { %s705_s15 = sadd.f32 %s704_s30, %s700_s23 }
 0x613   : > { %s706_s1 = smul.f32 0.5, %s705_s15 }
 0x615   : > { %708 = sst [smem:[#allocation17]] %s706_s1 }
 0x616 PF: > { %s1699_s17 = sadd.s32 4294967295, %s1263_s29   ;;  %s1279_s10 = smov [#allocation18]  }
 0x617   : > { %p931_p8 = scmp.eq.s32.totalorder %s1699_s17, 3  ;;  %s1280_s7 = smov [#allocation17]  }
 0x618   : > { %s1281_s26 = smov [#allocation20]   ;;  %s1700_s13 = sld [smem:[#allocation27_spill]] }
 0x619   : > { %914 = dma.smem_to_hbm (%p931_p8), %s1279_s10, 16, %s1680_s4, [#allocation19]  }
 0x61a   : > { %912 = dma.smem_to_hbm (%p931_p8), %s1280_s7, 16, %s1679_s3, [#allocation14]  }
 0x61e   : > { %916 = dma.smem_to_hbm (%p931_p8), %s1281_s26, 16, %s1700_s13, [#allocation19]  }
 0x61f   : > { %1214 = dma.done.wait (%p931_p8), [#allocation14], 16  }
 0x620   : > { %1216 = vsyncadd (%p931_p8), [#allocation14], 4294967280 }
 0x621   : > { %1218 = dma.done.wait (%p931_p8), [#allocation19], 32  }
 0x622   : > { %1220 = vsyncadd (%p931_p8), [#allocation19], 4294967264 }
 0x623   : > { %756 = sfence }
 0x624 PF: > { %s25_s29 = sadd.s32 1, %s1263_s29   ;;  %s1701_s19 = sld [smem:[#allocation25_spill]] }
 0x625   : > { %p22_p4 = scmp.ge.s32.totalorder %s25_s29, 6   ;;  %s1702_s20 = smov %s1227_s21 }
 0x626   : > { %s1703_s21 = smov %s1231_s22  ;;  %s1704_s22 = smov %s1445_s18 }
 0x627   : > { %s1705_s23 = smov %s1239_s24  ;;  %s1706_s24 = smov %s1243_s25 }
 0x628   : > { %s1707_s25 = smov %s1451_s9  ;;  %s1708_s26 = smov %s1255_s27 }
 0x629   : > { %s1709_s0 = smov %s1259_s28  ;;  %s1711_s28 = smov %s1717_s6 }
 0x62a   : > { %s1710_s27 = smov %s1701_s19  ;;  %24 = sbr.rel (!%p22_p4) target bundleno = 15 (0xf), region = 139 }
 0x62f   :  { %762 = vsyncpa [#allocation13], 1 }
 0x630   :  { %764 = vsyncpa [#allocation13 + $0x1], 1 }
 0x631   :  { %765 = vsyncpa [#allocation16], 1 }
 0x632   :  { %767 = vsyncpa [#allocation16 + $0x1], 1 }
 0x633   :  { %768 = vsyncpa [#allocation14], 1 }
 0x634   :  { %770 = vsyncpa [#allocation14 + $0x1], 1 }
 0x635   :  { %771 = vsyncpa [#allocation19], 1 }

</bundles_post_ra>
